<compile_context>
chip_gen: v7x
topology: tpu7x:2x2x1
jax: 0.10.0
libtpu: 0.0.40
codegen_flags: <defaults>
</compile_context>

<pallas_src>
import jax
import jax.numpy as jnp
from jax.experimental import pallas as pl
from jax.experimental.pallas import tpu as pltpu


# ---------------------------------------------------------------------------
# in-kernel helpers (traced inside the Pallas kernel)
# ---------------------------------------------------------------------------
def _layernorm_f32(x, gamma, beta, eps=1e-5):
    mu = jnp.mean(x, axis=-1, keepdims=True)
    var = jnp.mean((x - mu) ** 2, axis=-1, keepdims=True)
    return (x - mu) * jax.lax.rsqrt(var + eps) * gamma + beta


def _gelu(x):
    # TODO(synk): PyTorch nn.GELU defaults to the exact erf form; the tanh
    # approximation is used to stay on guaranteed Mosaic transcendentals.
    c = jnp.float32(0.7978845608028654)  # sqrt(2/pi)
    return 0.5 * x * (1.0 + jnp.tanh(c * (x + 0.044715 * x * x * x)))


# ---------------------------------------------------------------------------
# Pallas kernel: one transformer Block for (batch element b, query tile qi)
# ---------------------------------------------------------------------------
def _block_kernel(xf_ref, xt_ref, g1_ref, b1_ref, wq_ref, wk_ref, wv_ref,
                  wp_ref, bp_ref, g2_ref, b2_ref, w1_ref, bb1_ref,
                  w2_ref, bb2_ref, o_ref, k_scr, v_scr):
    f32 = jnp.float32
    cdt = wq_ref.dtype                        # compute (MXU input) dtype
    num_heads = wq_ref.shape[0]
    qi = pl.program_id(1)

    g1 = g1_ref[...].astype(f32)
    b1 = b1_ref[...].astype(f32)

    # ---- K / V head caches: built once per batch element, reused by q-tiles.
    @pl.when(qi == 0)
    def _():
        xn_all = _layernorm_f32(xf_ref[0].astype(f32), g1, b1).astype(cdt)
        for h in range(num_heads):
            k_scr[h] = jnp.dot(xn_all, wk_ref[h],
                               preferred_element_type=f32).astype(cdt)
            v_scr[h] = jnp.dot(xn_all, wv_ref[h],
                               preferred_element_type=f32).astype(cdt)

    # ---- attention branch for this query-row tile -------------------------
    x_t = xt_ref[0].astype(f32)                                   # (TQ, C)
    xn_t = _layernorm_f32(x_t, g1, b1).astype(cdt)

    acc = jnp.zeros(x_t.shape, f32)                               # (TQ, C)
    for h in range(num_heads):
        # 1/sqrt(hd) is already folded into wq on the host.
        q = jnp.dot(xn_t, wq_ref[h], preferred_element_type=f32).astype(cdt)
        s = jax.lax.dot_general(q, k_scr[h], (((1,), (1,)), ((), ())),
                                preferred_element_type=f32)       # (TQ, N)
        s = s - jnp.max(s, axis=-1, keepdims=True)
        p = jnp.exp(s)
        p = p * pl.reciprocal(jnp.sum(p, axis=-1, keepdims=True), approx=True)
        o = jnp.dot(p.astype(cdt), v_scr[h], preferred_element_type=f32)
        # accumulate through this head's slice of the output projection
        acc = acc + jnp.dot(o.astype(cdt), wp_ref[h],
                            preferred_element_type=f32)           # (TQ, C)

    x1 = x_t + acc + bp_ref[...].astype(f32)                      # residual 1

    # ---- MLP branch --------------------------------------------------------
    xn2 = _layernorm_f32(x1, g2_ref[...].astype(f32),
                         b2_ref[...].astype(f32)).astype(cdt)
    h1 = jnp.dot(xn2, w1_ref[...],
                 preferred_element_type=f32) + bb1_ref[...].astype(f32)
    h1 = _gelu(h1).astype(cdt)
    h2 = jnp.dot(h1, w2_ref[...],
                 preferred_element_type=f32) + bb2_ref[...].astype(f32)

    o_ref[0] = (x1 + h2).astype(o_ref.dtype)                      # residual 2


# ---------------------------------------------------------------------------
# wrapper
# ---------------------------------------------------------------------------
def vit_block(x, params, num_heads, *, compute_dtype=jnp.bfloat16, q_tile=None):
    B, N, C = x.shape
    hd = C // num_heads
    scale = hd ** -0.5
    cdt = compute_dtype
    f32 = jnp.float32

    if q_tile is None:
        q_tile = 128 if (N > 128 and N % 128 == 0) else N
    assert N % q_tile == 0, "q_tile must divide N (pad N for ragged seq lens)"
    num_q = N // q_tile

    # ---- host-side weight re-layout: per-head, scale folded into Q --------
    wqkv = params["wqkv"].astype(f32)          # (C, 3C), cols ordered [3, H, hd]
    wq = (wqkv[:, :C] * scale).reshape(C, num_heads, hd)
    wq = wq.transpose(1, 0, 2).astype(cdt)                         # (H, C, hd)
    wk = wqkv[:, C:2 * C].reshape(C, num_heads, hd).transpose(1, 0, 2).astype(cdt)
    wv = wqkv[:, 2 * C:].reshape(C, num_heads, hd).transpose(1, 0, 2).astype(cdt)
    wp = params["wproj"].astype(f32).reshape(num_heads, hd, C).astype(cdt)
    w1 = params["w1"].astype(cdt)
    w2 = params["w2"].astype(cdt)

    g1 = params["g1"].astype(f32); b1 = params["b1"].astype(f32)
    g2 = params["g2"].astype(f32); b2 = params["b2"].astype(f32)
    bp = params["bproj"].astype(f32)
    bb1 = params["bb1"].astype(f32); bb2 = params["bb2"].astype(f32)

    def full(arr):
        zeros = (0,) * arr.ndim
        return pl.BlockSpec(arr.shape, lambda b, q: zeros)

    # ---- explicit VMEM budget (double-buffered blocks + K/V scratch) -------
    def nbytes(a):
        return a.size * a.dtype.itemsize
    resident = 2 * sum(nbytes(a) for a in
                       (wq, wk, wv, wp, w1, w2, g1, b1, g2, b2, bp, bb1, bb2))
    resident += 2 * (N * C + 2 * q_tile * C) * x.dtype.itemsize     # x (2 views) + out
    resident += 2 * num_heads * N * hd * jnp.dtype(cdt).itemsize    # K/V caches
    vmem_limit = int(min(96 * 2**20, max(32 * 2**20, resident + 4 * 2**20)))

    return pl.pallas_call(
        _block_kernel,
        out_shape=jax.ShapeDtypeStruct((B, N, C), x.dtype),
        grid=(B, num_q),
        in_specs=[
            pl.BlockSpec((1, N, C), lambda b, q: (b, 0, 0)),        # x, full rows (K/V)
            pl.BlockSpec((1, q_tile, C), lambda b, q: (b, q, 0)),   # x, query tile
            full(g1), full(b1),
            full(wq), full(wk), full(wv),
            full(wp), full(bp),
            full(g2), full(b2),
            full(w1), full(bb1), full(w2), full(bb2),
        ],
        out_specs=pl.BlockSpec((1, q_tile, C), lambda b, q: (b, q, 0)),
        scratch_shapes=[
            pltpu.VMEM((num_heads, N, hd), cdt),    # K cache (per head)
            pltpu.VMEM((num_heads, N, hd), cdt),    # V cache (per head)
        ],
        compiler_params=pltpu.CompilerParams(
            dimension_semantics=("parallel", "arbitrary"),
            vmem_limit_bytes=vmem_limit,
        ),
    )(x, x, g1, b1, wq, wk, wv, wp, bp, g2, b2, w1, bb1, w2, bb2)


# ---------------------------------------------------------------------------
# pure-JAX reference (same math) for a correctness check
# ---------------------------------------------------------------------------
def vit_block_ref(x, params, num_heads):
    B, N, C = x.shape
    hd = C // num_heads
    scale = hd ** -0.5

    def ln(z, g, b):
        mu = jnp.mean(z, axis=-1, keepdims=True)
        var = jnp.mean((z - mu) ** 2, axis=-1, keepdims=True)
        return (z - mu) * jax.lax.rsqrt(var + 1e-5) * g + b

    xn = ln(x, params["g1"], params["b1"])
    qkv = xn @ params["wqkv"]                                     # (B,N,3C)
    qkv = qkv.reshape(B, N, 3, num_heads, hd).transpose(2, 0, 3, 1, 4)
    q, k, v = qkv[0], qkv[1], qkv[2]                              # (B,H,N,hd)
    attn = jnp.einsum("bhqd,bhkd->bhqk", q, k) * scale
    attn = jax.nn.softmax(attn, axis=-1)
    out = jnp.einsum("bhqk,bhkd->bhqd", attn, v)
    out = out.transpose(0, 2, 1, 3).reshape(B, N, C)
    out = out @ params["wproj"] + params["bproj"]
    x = x + out

    xn2 = ln(x, params["g2"], params["b2"])
    h1 = _gelu(xn2 @ params["w1"] + params["bb1"])
    h2 = h1 @ params["w2"] + params["bb2"]
    return x + h2


# ---------------------------------------------------------------------------
if __name__ == "__main__":
    B, N, C = 2, 8, 32
    num_heads = 4
    mlp_ratio = 4.0
    hidden = int(C * mlp_ratio)

    key = jax.random.PRNGKey(0)
    ks = jax.random.split(key, 8)

    params = {
        "g1": jnp.ones((1, C), jnp.float32),
        "b1": jnp.zeros((1, C), jnp.float32),
        "wqkv": 0.05 * jax.random.normal(ks[0], (C, 3 * C), jnp.float32),
        "wproj": 0.05 * jax.random.normal(ks[1], (C, C), jnp.float32),
        "bproj": 0.05 * jax.random.normal(ks[2], (1, C), jnp.float32),
        "g2": jnp.ones((1, C), jnp.float32),
        "b2": jnp.zeros((1, C), jnp.float32),
        "w1": 0.05 * jax.random.normal(ks[3], (C, hidden), jnp.float32),
        "bb1": 0.05 * jax.random.normal(ks[4], (1, hidden), jnp.float32),
        "w2": 0.05 * jax.random.normal(ks[5], (hidden, C), jnp.float32),
        "bb2": 0.05 * jax.random.normal(ks[6], (1, C), jnp.float32),
    }
    x = jax.random.normal(ks[7], (B, N, C), jnp.float32)

    ref = jax.block_until_ready(vit_block_ref(x, params, num_heads))

    # fp32 compute path (tight check; only the approx reciprocal differs)
    out32 = jax.block_until_ready(
        vit_block(x, params, num_heads, compute_dtype=jnp.float32))
    assert out32.shape == (B, N, C)
    assert jnp.allclose(out32, ref, atol=5e-3, rtol=5e-3), (
        float(jnp.max(jnp.abs(out32 - ref))))

    # bf16 compute path (default; MXU-native on v6e/v7x)
    out16 = jax.block_until_ready(vit_block(x, params, num_heads))
    assert out16.shape == (B, N, C)
    assert jnp.allclose(out16, ref, atol=5e-2, rtol=5e-2), (
        float(jnp.max(jnp.abs(out16 - ref))))

    print("KERNEL_OK")
</pallas_src>

<mosaic_0001>
module attributes {stable_mosaic.version = 11 : i64} {
  func.func @_block_kernel(%arg0: i32, %arg1: i32, %arg2: memref<1x8x32xf32, #tpu.memory_space<vmem>>, %arg3: memref<1x8x32xf32, #tpu.memory_space<vmem>>, %arg4: memref<1x32xf32, #tpu.memory_space<vmem>>, %arg5: memref<1x32xf32, #tpu.memory_space<vmem>>, %arg6: memref<4x32x8xf32, #tpu.memory_space<vmem>>, %arg7: memref<4x32x8xf32, #tpu.memory_space<vmem>>, %arg8: memref<4x32x8xf32, #tpu.memory_space<vmem>>, %arg9: memref<4x8x32xf32, #tpu.memory_space<vmem>>, %arg10: memref<1x32xf32, #tpu.memory_space<vmem>>, %arg11: memref<1x32xf32, #tpu.memory_space<vmem>>, %arg12: memref<1x32xf32, #tpu.memory_space<vmem>>, %arg13: memref<32x128xf32, #tpu.memory_space<vmem>>, %arg14: memref<1x128xf32, #tpu.memory_space<vmem>>, %arg15: memref<128x32xf32, #tpu.memory_space<vmem>>, %arg16: memref<1x32xf32, #tpu.memory_space<vmem>>, %arg17: memref<1x8x32xf32, #tpu.memory_space<vmem>>, %arg18: memref<4x8x8xf32, #tpu.memory_space<vmem>>, %arg19: memref<4x8x8xf32, #tpu.memory_space<vmem>>) attributes {dimension_semantics = [#tpu.dimension_semantics<parallel>, #tpu.dimension_semantics<arbitrary>], iteration_bounds = array<i64: 2, 1>, scalar_prefetch = 0 : i64, scratch_operands = 2 : i64, tpu.core_type = #tpu.core_type<tc>, window_params = [{transform_indices = @transform_0, window_bounds = array<i64: 1, 8, 32>}, {transform_indices = @transform_1, window_bounds = array<i64: 1, 8, 32>}, {pipeline_mode = #tpu.pipeline_mode<synchronous>, transform_indices = @transform_2, window_bounds = array<i64: 1, 32>}, {pipeline_mode = #tpu.pipeline_mode<synchronous>, transform_indices = @transform_3, window_bounds = array<i64: 1, 32>}, {pipeline_mode = #tpu.pipeline_mode<synchronous>, transform_indices = @transform_4, window_bounds = array<i64: 4, 32, 8>}, {pipeline_mode = #tpu.pipeline_mode<synchronous>, transform_indices = @transform_5, window_bounds = array<i64: 4, 32, 8>}, {pipeline_mode = #tpu.pipeline_mode<synchronous>, transform_indices = @transform_6, window_bounds = array<i64: 4, 32, 8>}, {pipeline_mode = #tpu.pipeline_mode<synchronous>, transform_indices = @transform_7, window_bounds = array<i64: 4, 8, 32>}, {pipeline_mode = #tpu.pipeline_mode<synchronous>, transform_indices = @transform_8, window_bounds = array<i64: 1, 32>}, {pipeline_mode = #tpu.pipeline_mode<synchronous>, transform_indices = @transform_9, window_bounds = array<i64: 1, 32>}, {pipeline_mode = #tpu.pipeline_mode<synchronous>, transform_indices = @transform_10, window_bounds = array<i64: 1, 32>}, {pipeline_mode = #tpu.pipeline_mode<synchronous>, transform_indices = @transform_11, window_bounds = array<i64: 32, 128>}, {pipeline_mode = #tpu.pipeline_mode<synchronous>, transform_indices = @transform_12, window_bounds = array<i64: 1, 128>}, {pipeline_mode = #tpu.pipeline_mode<synchronous>, transform_indices = @transform_13, window_bounds = array<i64: 128, 32>}, {pipeline_mode = #tpu.pipeline_mode<synchronous>, transform_indices = @transform_14, window_bounds = array<i64: 1, 32>}, {transform_indices = @transform_15, window_bounds = array<i64: 1, 8, 32>}]} {
    %c0 = arith.constant 0 : index
    %c0_0 = arith.constant 0 : index
    %0 = vector.load %arg4[%c0, %c0_0] : memref<1x32xf32, #tpu.memory_space<vmem>>, vector<1x32xf32>
    %c0_1 = arith.constant 0 : index
    %c0_2 = arith.constant 0 : index
    %1 = vector.load %arg5[%c0_1, %c0_2] : memref<1x32xf32, #tpu.memory_space<vmem>>, vector<1x32xf32>
    %c0_i32 = arith.constant 0 : i32
    %2 = arith.cmpi eq, %arg1, %c0_i32 : i32
    %3 = arith.extui %2 : i1 to i32
    %c0_i32_3 = arith.constant 0 : i32
    %4 = arith.cmpi ne, %3, %c0_i32_3 : i32
    scf.if %4 {
      %c0_109 = arith.constant 0 : index
      %c0_110 = arith.constant 0 : index
      %c0_111 = arith.constant 0 : index
      %177 = vector.load %arg2[%c0_109, %c0_110, %c0_111] : memref<1x8x32xf32, #tpu.memory_space<vmem>>, vector<1x8x32xf32>
      %178 = vector.shape_cast %177 : vector<1x8x32xf32> to vector<8x32xf32>
      %cst_112 = arith.constant dense<0.000000e+00> : vector<8xf32>
      %179 = vector.multi_reduction <add>, %178, %cst_112 [1] : vector<8x32xf32> to vector<8xf32>
      %180 = vector.shape_cast %179 : vector<8xf32> to vector<8x1xf32>
      %cst_113 = arith.constant 3.200000e+01 : f32
      %181 = vector.broadcast %cst_113 : f32 to vector<8x1xf32>
      %182 = arith.divf %180, %181 : vector<8x1xf32>
      %183 = vector.broadcast %182 : vector<8x1xf32> to vector<8x32xf32>
      %184 = arith.subf %178, %183 : vector<8x32xf32>
      %185 = arith.mulf %184, %184 : vector<8x32xf32>
      %cst_114 = arith.constant dense<0.000000e+00> : vector<8xf32>
      %186 = vector.multi_reduction <add>, %185, %cst_114 [1] : vector<8x32xf32> to vector<8xf32>
      %187 = vector.shape_cast %186 : vector<8xf32> to vector<8x1xf32>
      %cst_115 = arith.constant 3.200000e+01 : f32
      %188 = vector.broadcast %cst_115 : f32 to vector<8x1xf32>
      %189 = arith.divf %187, %188 : vector<8x1xf32>
      %190 = vector.broadcast %182 : vector<8x1xf32> to vector<8x32xf32>
      %191 = arith.subf %178, %190 : vector<8x32xf32>
      %cst_116 = arith.constant 9.99999974E-6 : f32
      %192 = vector.broadcast %cst_116 : f32 to vector<8x1xf32>
      %193 = arith.addf %189, %192 : vector<8x1xf32>
      %194 = math.rsqrt %193 : vector<8x1xf32>
      %195 = vector.broadcast %194 : vector<8x1xf32> to vector<8x32xf32>
      %196 = arith.mulf %191, %195 : vector<8x32xf32>
      %197 = vector.broadcast %0 : vector<1x32xf32> to vector<8x32xf32>
      %198 = arith.mulf %196, %197 : vector<8x32xf32>
      %199 = vector.broadcast %1 : vector<1x32xf32> to vector<8x32xf32>
      %200 = arith.addf %198, %199 : vector<8x32xf32>
      %c0_117 = arith.constant 0 : index
      %c0_118 = arith.constant 0 : index
      %c0_119 = arith.constant 0 : index
      %201 = vector.load %arg7[%c0_117, %c0_118, %c0_119] : memref<4x32x8xf32, #tpu.memory_space<vmem>>, vector<1x32x8xf32>
      %202 = vector.shape_cast %201 : vector<1x32x8xf32> to vector<32x8xf32>
      %cst_120 = arith.constant dense<0.000000e+00> : vector<8x8xf32>
      %203 = tpu.matmul %200, %202, %cst_120 {dimension_numbers = #tpu.dot_dimension_numbers<[1], [0], [0], [1], [0, 0, 1, 1], [], []>} : vector<8x32xf32>, vector<32x8xf32>, vector<8x8xf32> -> vector<8x8xf32>
      %c0_121 = arith.constant 0 : index
      %c0_122 = arith.constant 0 : index
      %c0_123 = arith.constant 0 : index
      %204 = vector.load %arg18[%c0_121, %c0_122, %c0_123] : memref<4x8x8xf32, #tpu.memory_space<vmem>>, vector<1x8x8xf32>
      %205 = vector.shape_cast %204 : vector<1x8x8xf32> to vector<8x8xf32>
      %206 = vector.shape_cast %203 : vector<8x8xf32> to vector<1x8x8xf32>
      tpu.vector_store %arg18[%c0_121, %c0_122, %c0_123], %206 {strides = array<i32>} : memref<4x8x8xf32, #tpu.memory_space<vmem>>, vector<1x8x8xf32>,
      %c0_124 = arith.constant 0 : index
      %c0_125 = arith.constant 0 : index
      %c0_126 = arith.constant 0 : index
      %207 = vector.load %arg8[%c0_124, %c0_125, %c0_126] : memref<4x32x8xf32, #tpu.memory_space<vmem>>, vector<1x32x8xf32>
      %208 = vector.shape_cast %207 : vector<1x32x8xf32> to vector<32x8xf32>
      %cst_127 = arith.constant dense<0.000000e+00> : vector<8x8xf32>
      %209 = tpu.matmul %200, %208, %cst_127 {dimension_numbers = #tpu.dot_dimension_numbers<[1], [0], [0], [1], [0, 0, 1, 1], [], []>} : vector<8x32xf32>, vector<32x8xf32>, vector<8x8xf32> -> vector<8x8xf32>
      %c0_128 = arith.constant 0 : index
      %c0_129 = arith.constant 0 : index
      %c0_130 = arith.constant 0 : index
      %210 = vector.load %arg19[%c0_128, %c0_129, %c0_130] : memref<4x8x8xf32, #tpu.memory_space<vmem>>, vector<1x8x8xf32>
      %211 = vector.shape_cast %210 : vector<1x8x8xf32> to vector<8x8xf32>
      %212 = vector.shape_cast %209 : vector<8x8xf32> to vector<1x8x8xf32>
      tpu.vector_store %arg19[%c0_128, %c0_129, %c0_130], %212 {strides = array<i32>} : memref<4x8x8xf32, #tpu.memory_space<vmem>>, vector<1x8x8xf32>,
      %c1_131 = arith.constant 1 : index
      %c0_132 = arith.constant 0 : index
      %c0_133 = arith.constant 0 : index
      %213 = vector.load %arg7[%c1_131, %c0_132, %c0_133] : memref<4x32x8xf32, #tpu.memory_space<vmem>>, vector<1x32x8xf32>
      %214 = vector.shape_cast %213 : vector<1x32x8xf32> to vector<32x8xf32>
      %cst_134 = arith.constant dense<0.000000e+00> : vector<8x8xf32>
      %215 = tpu.matmul %200, %214, %cst_134 {dimension_numbers = #tpu.dot_dimension_numbers<[1], [0], [0], [1], [0, 0, 1, 1], [], []>} : vector<8x32xf32>, vector<32x8xf32>, vector<8x8xf32> -> vector<8x8xf32>
      %c1_135 = arith.constant 1 : index
      %c0_136 = arith.constant 0 : index
      %c0_137 = arith.constant 0 : index
      %216 = vector.load %arg18[%c1_135, %c0_136, %c0_137] : memref<4x8x8xf32, #tpu.memory_space<vmem>>, vector<1x8x8xf32>
      %217 = vector.shape_cast %216 : vector<1x8x8xf32> to vector<8x8xf32>
      %218 = vector.shape_cast %215 : vector<8x8xf32> to vector<1x8x8xf32>
      tpu.vector_store %arg18[%c1_135, %c0_136, %c0_137], %218 {strides = array<i32>} : memref<4x8x8xf32, #tpu.memory_space<vmem>>, vector<1x8x8xf32>,
      %c1_138 = arith.constant 1 : index
      %c0_139 = arith.constant 0 : index
      %c0_140 = arith.constant 0 : index
      %219 = vector.load %arg8[%c1_138, %c0_139, %c0_140] : memref<4x32x8xf32, #tpu.memory_space<vmem>>, vector<1x32x8xf32>
      %220 = vector.shape_cast %219 : vector<1x32x8xf32> to vector<32x8xf32>
      %cst_141 = arith.constant dense<0.000000e+00> : vector<8x8xf32>
      %221 = tpu.matmul %200, %220, %cst_141 {dimension_numbers = #tpu.dot_dimension_numbers<[1], [0], [0], [1], [0, 0, 1, 1], [], []>} : vector<8x32xf32>, vector<32x8xf32>, vector<8x8xf32> -> vector<8x8xf32>
      %c1_142 = arith.constant 1 : index
      %c0_143 = arith.constant 0 : index
      %c0_144 = arith.constant 0 : index
      %222 = vector.load %arg19[%c1_142, %c0_143, %c0_144] : memref<4x8x8xf32, #tpu.memory_space<vmem>>, vector<1x8x8xf32>
      %223 = vector.shape_cast %222 : vector<1x8x8xf32> to vector<8x8xf32>
      %224 = vector.shape_cast %221 : vector<8x8xf32> to vector<1x8x8xf32>
      tpu.vector_store %arg19[%c1_142, %c0_143, %c0_144], %224 {strides = array<i32>} : memref<4x8x8xf32, #tpu.memory_space<vmem>>, vector<1x8x8xf32>,
      %c2_145 = arith.constant 2 : index
      %c0_146 = arith.constant 0 : index
      %c0_147 = arith.constant 0 : index
      %225 = vector.load %arg7[%c2_145, %c0_146, %c0_147] : memref<4x32x8xf32, #tpu.memory_space<vmem>>, vector<1x32x8xf32>
      %226 = vector.shape_cast %225 : vector<1x32x8xf32> to vector<32x8xf32>
      %cst_148 = arith.constant dense<0.000000e+00> : vector<8x8xf32>
      %227 = tpu.matmul %200, %226, %cst_148 {dimension_numbers = #tpu.dot_dimension_numbers<[1], [0], [0], [1], [0, 0, 1, 1], [], []>} : vector<8x32xf32>, vector<32x8xf32>, vector<8x8xf32> -> vector<8x8xf32>
      %c2_149 = arith.constant 2 : index
      %c0_150 = arith.constant 0 : index
      %c0_151 = arith.constant 0 : index
      %228 = vector.load %arg18[%c2_149, %c0_150, %c0_151] : memref<4x8x8xf32, #tpu.memory_space<vmem>>, vector<1x8x8xf32>
      %229 = vector.shape_cast %228 : vector<1x8x8xf32> to vector<8x8xf32>
      %230 = vector.shape_cast %227 : vector<8x8xf32> to vector<1x8x8xf32>
      tpu.vector_store %arg18[%c2_149, %c0_150, %c0_151], %230 {strides = array<i32>} : memref<4x8x8xf32, #tpu.memory_space<vmem>>, vector<1x8x8xf32>,
      %c2_152 = arith.constant 2 : index
      %c0_153 = arith.constant 0 : index
      %c0_154 = arith.constant 0 : index
      %231 = vector.load %arg8[%c2_152, %c0_153, %c0_154] : memref<4x32x8xf32, #tpu.memory_space<vmem>>, vector<1x32x8xf32>
      %232 = vector.shape_cast %231 : vector<1x32x8xf32> to vector<32x8xf32>
      %cst_155 = arith.constant dense<0.000000e+00> : vector<8x8xf32>
      %233 = tpu.matmul %200, %232, %cst_155 {dimension_numbers = #tpu.dot_dimension_numbers<[1], [0], [0], [1], [0, 0, 1, 1], [], []>} : vector<8x32xf32>, vector<32x8xf32>, vector<8x8xf32> -> vector<8x8xf32>
      %c2_156 = arith.constant 2 : index
      %c0_157 = arith.constant 0 : index
      %c0_158 = arith.constant 0 : index
      %234 = vector.load %arg19[%c2_156, %c0_157, %c0_158] : memref<4x8x8xf32, #tpu.memory_space<vmem>>, vector<1x8x8xf32>
      %235 = vector.shape_cast %234 : vector<1x8x8xf32> to vector<8x8xf32>
      %236 = vector.shape_cast %233 : vector<8x8xf32> to vector<1x8x8xf32>
      tpu.vector_store %arg19[%c2_156, %c0_157, %c0_158], %236 {strides = array<i32>} : memref<4x8x8xf32, #tpu.memory_space<vmem>>, vector<1x8x8xf32>,
      %c3_159 = arith.constant 3 : index
      %c0_160 = arith.constant 0 : index
      %c0_161 = arith.constant 0 : index
      %237 = vector.load %arg7[%c3_159, %c0_160, %c0_161] : memref<4x32x8xf32, #tpu.memory_space<vmem>>, vector<1x32x8xf32>
      %238 = vector.shape_cast %237 : vector<1x32x8xf32> to vector<32x8xf32>
      %cst_162 = arith.constant dense<0.000000e+00> : vector<8x8xf32>
      %239 = tpu.matmul %200, %238, %cst_162 {dimension_numbers = #tpu.dot_dimension_numbers<[1], [0], [0], [1], [0, 0, 1, 1], [], []>} : vector<8x32xf32>, vector<32x8xf32>, vector<8x8xf32> -> vector<8x8xf32>
      %c3_163 = arith.constant 3 : index
      %c0_164 = arith.constant 0 : index
      %c0_165 = arith.constant 0 : index
      %240 = vector.load %arg18[%c3_163, %c0_164, %c0_165] : memref<4x8x8xf32, #tpu.memory_space<vmem>>, vector<1x8x8xf32>
      %241 = vector.shape_cast %240 : vector<1x8x8xf32> to vector<8x8xf32>
      %242 = vector.shape_cast %239 : vector<8x8xf32> to vector<1x8x8xf32>
      tpu.vector_store %arg18[%c3_163, %c0_164, %c0_165], %242 {strides = array<i32>} : memref<4x8x8xf32, #tpu.memory_space<vmem>>, vector<1x8x8xf32>,
      %c3_166 = arith.constant 3 : index
      %c0_167 = arith.constant 0 : index
      %c0_168 = arith.constant 0 : index
      %243 = vector.load %arg8[%c3_166, %c0_167, %c0_168] : memref<4x32x8xf32, #tpu.memory_space<vmem>>, vector<1x32x8xf32>
      %244 = vector.shape_cast %243 : vector<1x32x8xf32> to vector<32x8xf32>
      %cst_169 = arith.constant dense<0.000000e+00> : vector<8x8xf32>
      %245 = tpu.matmul %200, %244, %cst_169 {dimension_numbers = #tpu.dot_dimension_numbers<[1], [0], [0], [1], [0, 0, 1, 1], [], []>} : vector<8x32xf32>, vector<32x8xf32>, vector<8x8xf32> -> vector<8x8xf32>
      %c3_170 = arith.constant 3 : index
      %c0_171 = arith.constant 0 : index
      %c0_172 = arith.constant 0 : index
      %246 = vector.load %arg19[%c3_170, %c0_171, %c0_172] : memref<4x8x8xf32, #tpu.memory_space<vmem>>, vector<1x8x8xf32>
      %247 = vector.shape_cast %246 : vector<1x8x8xf32> to vector<8x8xf32>
      %248 = vector.shape_cast %245 : vector<8x8xf32> to vector<1x8x8xf32>
      tpu.vector_store %arg19[%c3_170, %c0_171, %c0_172], %248 {strides = array<i32>} : memref<4x8x8xf32, #tpu.memory_space<vmem>>, vector<1x8x8xf32>,
    } else {
    }
    %c0_4 = arith.constant 0 : index
    %c0_5 = arith.constant 0 : index
    %c0_6 = arith.constant 0 : index
    %5 = vector.load %arg3[%c0_4, %c0_5, %c0_6] : memref<1x8x32xf32, #tpu.memory_space<vmem>>, vector<1x8x32xf32>
    %6 = vector.shape_cast %5 : vector<1x8x32xf32> to vector<8x32xf32>
    %cst = arith.constant dense<0.000000e+00> : vector<8xf32>
    %7 = vector.multi_reduction <add>, %6, %cst [1] : vector<8x32xf32> to vector<8xf32>
    %8 = vector.shape_cast %7 : vector<8xf32> to vector<8x1xf32>
    %cst_7 = arith.constant 3.200000e+01 : f32
    %9 = vector.broadcast %cst_7 : f32 to vector<8x1xf32>
    %10 = arith.divf %8, %9 : vector<8x1xf32>
    %11 = vector.broadcast %10 : vector<8x1xf32> to vector<8x32xf32>
    %12 = arith.subf %6, %11 : vector<8x32xf32>
    %13 = arith.mulf %12, %12 : vector<8x32xf32>
    %cst_8 = arith.constant dense<0.000000e+00> : vector<8xf32>
    %14 = vector.multi_reduction <add>, %13, %cst_8 [1] : vector<8x32xf32> to vector<8xf32>
    %15 = vector.shape_cast %14 : vector<8xf32> to vector<8x1xf32>
    %cst_9 = arith.constant 3.200000e+01 : f32
    %16 = vector.broadcast %cst_9 : f32 to vector<8x1xf32>
    %17 = arith.divf %15, %16 : vector<8x1xf32>
    %18 = vector.broadcast %10 : vector<8x1xf32> to vector<8x32xf32>
    %19 = arith.subf %6, %18 : vector<8x32xf32>
    %cst_10 = arith.constant 9.99999974E-6 : f32
    %20 = vector.broadcast %cst_10 : f32 to vector<8x1xf32>
    %21 = arith.addf %17, %20 : vector<8x1xf32>
    %22 = math.rsqrt %21 : vector<8x1xf32>
    %23 = vector.broadcast %22 : vector<8x1xf32> to vector<8x32xf32>
    %24 = arith.mulf %19, %23 : vector<8x32xf32>
    %25 = vector.broadcast %0 : vector<1x32xf32> to vector<8x32xf32>
    %26 = arith.mulf %24, %25 : vector<8x32xf32>
    %27 = vector.broadcast %1 : vector<1x32xf32> to vector<8x32xf32>
    %28 = arith.addf %26, %27 : vector<8x32xf32>
    %cst_11 = arith.constant 0.000000e+00 : f32
    %29 = vector.broadcast %cst_11 : f32 to vector<8x32xf32>
    %c0_12 = arith.constant 0 : index
    %c0_13 = arith.constant 0 : index
    %c0_14 = arith.constant 0 : index
    %30 = vector.load %arg6[%c0_12, %c0_13, %c0_14] : memref<4x32x8xf32, #tpu.memory_space<vmem>>, vector<1x32x8xf32>
    %31 = vector.shape_cast %30 : vector<1x32x8xf32> to vector<32x8xf32>
    %cst_15 = arith.constant dense<0.000000e+00> : vector<8x8xf32>
    %32 = tpu.matmul %28, %31, %cst_15 {dimension_numbers = #tpu.dot_dimension_numbers<[1], [0], [0], [1], [0, 0, 1, 1], [], []>} : vector<8x32xf32>, vector<32x8xf32>, vector<8x8xf32> -> vector<8x8xf32>
    %c0_16 = arith.constant 0 : index
    %c0_17 = arith.constant 0 : index
    %c0_18 = arith.constant 0 : index
    %33 = vector.load %arg18[%c0_16, %c0_17, %c0_18] : memref<4x8x8xf32, #tpu.memory_space<vmem>>, vector<1x8x8xf32>
    %34 = vector.shape_cast %33 : vector<1x8x8xf32> to vector<8x8xf32>
    %cst_19 = arith.constant dense<0.000000e+00> : vector<8x8xf32>
    %35 = tpu.matmul %32, %34, %cst_19 {dimension_numbers = #tpu.dot_dimension_numbers<[1], [1], [0], [0], [0, 0, 1, 0], [], []>} : vector<8x8xf32>, vector<8x8xf32>, vector<8x8xf32> -> vector<8x8xf32>
    %cst_20 = arith.constant dense<0xFF800000> : vector<8xf32>
    %36 = vector.multi_reduction <maximumf>, %35, %cst_20 [1] : vector<8x8xf32> to vector<8xf32>
    %37 = vector.shape_cast %36 : vector<8xf32> to vector<8x1xf32>
    %38 = vector.broadcast %37 : vector<8x1xf32> to vector<8x8xf32>
    %39 = arith.subf %35, %38 : vector<8x8xf32>
    %40 = math.exp %39 : vector<8x8xf32>
    %cst_21 = arith.constant dense<0.000000e+00> : vector<8xf32>
    %41 = vector.multi_reduction <add>, %40, %cst_21 [1] : vector<8x8xf32> to vector<8xf32>
    %42 = vector.shape_cast %41 : vector<8xf32> to vector<8x1xf32>
    %43 = tpu.reciprocal %42 {approx = true} : vector<8x1xf32> -> vector<8x1xf32>
    %44 = vector.broadcast %43 : vector<8x1xf32> to vector<8x8xf32>
    %45 = arith.mulf %40, %44 : vector<8x8xf32>
    %c0_22 = arith.constant 0 : index
    %c0_23 = arith.constant 0 : index
    %c0_24 = arith.constant 0 : index
    %46 = vector.load %arg19[%c0_22, %c0_23, %c0_24] : memref<4x8x8xf32, #tpu.memory_space<vmem>>, vector<1x8x8xf32>
    %47 = vector.shape_cast %46 : vector<1x8x8xf32> to vector<8x8xf32>
    %cst_25 = arith.constant dense<0.000000e+00> : vector<8x8xf32>
    %48 = tpu.matmul %45, %47, %cst_25 {dimension_numbers = #tpu.dot_dimension_numbers<[1], [0], [0], [1], [0, 0, 1, 1], [], []>} : vector<8x8xf32>, vector<8x8xf32>, vector<8x8xf32> -> vector<8x8xf32>
    %c0_26 = arith.constant 0 : index
    %c0_27 = arith.constant 0 : index
    %c0_28 = arith.constant 0 : index
    %49 = vector.load %arg9[%c0_26, %c0_27, %c0_28] : memref<4x8x32xf32, #tpu.memory_space<vmem>>, vector<1x8x32xf32>
    %50 = vector.shape_cast %49 : vector<1x8x32xf32> to vector<8x32xf32>
    %cst_29 = arith.constant dense<0.000000e+00> : vector<8x32xf32>
    %51 = tpu.matmul %48, %50, %cst_29 {dimension_numbers = #tpu.dot_dimension_numbers<[1], [0], [0], [1], [0, 0, 1, 1], [], []>} : vector<8x8xf32>, vector<8x32xf32>, vector<8x32xf32> -> vector<8x32xf32>
    %52 = arith.addf %29, %51 : vector<8x32xf32>
    %c1 = arith.constant 1 : index
    %c0_30 = arith.constant 0 : index
    %c0_31 = arith.constant 0 : index
    %53 = vector.load %arg6[%c1, %c0_30, %c0_31] : memref<4x32x8xf32, #tpu.memory_space<vmem>>, vector<1x32x8xf32>
    %54 = vector.shape_cast %53 : vector<1x32x8xf32> to vector<32x8xf32>
    %cst_32 = arith.constant dense<0.000000e+00> : vector<8x8xf32>
    %55 = tpu.matmul %28, %54, %cst_32 {dimension_numbers = #tpu.dot_dimension_numbers<[1], [0], [0], [1], [0, 0, 1, 1], [], []>} : vector<8x32xf32>, vector<32x8xf32>, vector<8x8xf32> -> vector<8x8xf32>
    %c1_33 = arith.constant 1 : index
    %c0_34 = arith.constant 0 : index
    %c0_35 = arith.constant 0 : index
    %56 = vector.load %arg18[%c1_33, %c0_34, %c0_35] : memref<4x8x8xf32, #tpu.memory_space<vmem>>, vector<1x8x8xf32>
    %57 = vector.shape_cast %56 : vector<1x8x8xf32> to vector<8x8xf32>
    %cst_36 = arith.constant dense<0.000000e+00> : vector<8x8xf32>
    %58 = tpu.matmul %55, %57, %cst_36 {dimension_numbers = #tpu.dot_dimension_numbers<[1], [1], [0], [0], [0, 0, 1, 0], [], []>} : vector<8x8xf32>, vector<8x8xf32>, vector<8x8xf32> -> vector<8x8xf32>
    %cst_37 = arith.constant dense<0xFF800000> : vector<8xf32>
    %59 = vector.multi_reduction <maximumf>, %58, %cst_37 [1] : vector<8x8xf32> to vector<8xf32>
    %60 = vector.shape_cast %59 : vector<8xf32> to vector<8x1xf32>
    %61 = vector.broadcast %60 : vector<8x1xf32> to vector<8x8xf32>
    %62 = arith.subf %58, %61 : vector<8x8xf32>
    %63 = math.exp %62 : vector<8x8xf32>
    %cst_38 = arith.constant dense<0.000000e+00> : vector<8xf32>
    %64 = vector.multi_reduction <add>, %63, %cst_38 [1] : vector<8x8xf32> to vector<8xf32>
    %65 = vector.shape_cast %64 : vector<8xf32> to vector<8x1xf32>
    %66 = tpu.reciprocal %65 {approx = true} : vector<8x1xf32> -> vector<8x1xf32>
    %67 = vector.broadcast %66 : vector<8x1xf32> to vector<8x8xf32>
    %68 = arith.mulf %63, %67 : vector<8x8xf32>
    %c1_39 = arith.constant 1 : index
    %c0_40 = arith.constant 0 : index
    %c0_41 = arith.constant 0 : index
    %69 = vector.load %arg19[%c1_39, %c0_40, %c0_41] : memref<4x8x8xf32, #tpu.memory_space<vmem>>, vector<1x8x8xf32>
    %70 = vector.shape_cast %69 : vector<1x8x8xf32> to vector<8x8xf32>
    %cst_42 = arith.constant dense<0.000000e+00> : vector<8x8xf32>
    %71 = tpu.matmul %68, %70, %cst_42 {dimension_numbers = #tpu.dot_dimension_numbers<[1], [0], [0], [1], [0, 0, 1, 1], [], []>} : vector<8x8xf32>, vector<8x8xf32>, vector<8x8xf32> -> vector<8x8xf32>
    %c1_43 = arith.constant 1 : index
    %c0_44 = arith.constant 0 : index
    %c0_45 = arith.constant 0 : index
    %72 = vector.load %arg9[%c1_43, %c0_44, %c0_45] : memref<4x8x32xf32, #tpu.memory_space<vmem>>, vector<1x8x32xf32>
    %73 = vector.shape_cast %72 : vector<1x8x32xf32> to vector<8x32xf32>
    %cst_46 = arith.constant dense<0.000000e+00> : vector<8x32xf32>
    %74 = tpu.matmul %71, %73, %cst_46 {dimension_numbers = #tpu.dot_dimension_numbers<[1], [0], [0], [1], [0, 0, 1, 1], [], []>} : vector<8x8xf32>, vector<8x32xf32>, vector<8x32xf32> -> vector<8x32xf32>
    %75 = arith.addf %52, %74 : vector<8x32xf32>
    %c2 = arith.constant 2 : index
    %c0_47 = arith.constant 0 : index
    %c0_48 = arith.constant 0 : index
    %76 = vector.load %arg6[%c2, %c0_47, %c0_48] : memref<4x32x8xf32, #tpu.memory_space<vmem>>, vector<1x32x8xf32>
    %77 = vector.shape_cast %76 : vector<1x32x8xf32> to vector<32x8xf32>
    %cst_49 = arith.constant dense<0.000000e+00> : vector<8x8xf32>
    %78 = tpu.matmul %28, %77, %cst_49 {dimension_numbers = #tpu.dot_dimension_numbers<[1], [0], [0], [1], [0, 0, 1, 1], [], []>} : vector<8x32xf32>, vector<32x8xf32>, vector<8x8xf32> -> vector<8x8xf32>
    %c2_50 = arith.constant 2 : index
    %c0_51 = arith.constant 0 : index
    %c0_52 = arith.constant 0 : index
    %79 = vector.load %arg18[%c2_50, %c0_51, %c0_52] : memref<4x8x8xf32, #tpu.memory_space<vmem>>, vector<1x8x8xf32>
    %80 = vector.shape_cast %79 : vector<1x8x8xf32> to vector<8x8xf32>
    %cst_53 = arith.constant dense<0.000000e+00> : vector<8x8xf32>
    %81 = tpu.matmul %78, %80, %cst_53 {dimension_numbers = #tpu.dot_dimension_numbers<[1], [1], [0], [0], [0, 0, 1, 0], [], []>} : vector<8x8xf32>, vector<8x8xf32>, vector<8x8xf32> -> vector<8x8xf32>
    %cst_54 = arith.constant dense<0xFF800000> : vector<8xf32>
    %82 = vector.multi_reduction <maximumf>, %81, %cst_54 [1] : vector<8x8xf32> to vector<8xf32>
    %83 = vector.shape_cast %82 : vector<8xf32> to vector<8x1xf32>
    %84 = vector.broadcast %83 : vector<8x1xf32> to vector<8x8xf32>
    %85 = arith.subf %81, %84 : vector<8x8xf32>
    %86 = math.exp %85 : vector<8x8xf32>
    %cst_55 = arith.constant dense<0.000000e+00> : vector<8xf32>
    %87 = vector.multi_reduction <add>, %86, %cst_55 [1] : vector<8x8xf32> to vector<8xf32>
    %88 = vector.shape_cast %87 : vector<8xf32> to vector<8x1xf32>
    %89 = tpu.reciprocal %88 {approx = true} : vector<8x1xf32> -> vector<8x1xf32>
    %90 = vector.broadcast %89 : vector<8x1xf32> to vector<8x8xf32>
    %91 = arith.mulf %86, %90 : vector<8x8xf32>
    %c2_56 = arith.constant 2 : index
    %c0_57 = arith.constant 0 : index
    %c0_58 = arith.constant 0 : index
    %92 = vector.load %arg19[%c2_56, %c0_57, %c0_58] : memref<4x8x8xf32, #tpu.memory_space<vmem>>, vector<1x8x8xf32>
    %93 = vector.shape_cast %92 : vector<1x8x8xf32> to vector<8x8xf32>
    %cst_59 = arith.constant dense<0.000000e+00> : vector<8x8xf32>
    %94 = tpu.matmul %91, %93, %cst_59 {dimension_numbers = #tpu.dot_dimension_numbers<[1], [0], [0], [1], [0, 0, 1, 1], [], []>} : vector<8x8xf32>, vector<8x8xf32>, vector<8x8xf32> -> vector<8x8xf32>
    %c2_60 = arith.constant 2 : index
    %c0_61 = arith.constant 0 : index
    %c0_62 = arith.constant 0 : index
    %95 = vector.load %arg9[%c2_60, %c0_61, %c0_62] : memref<4x8x32xf32, #tpu.memory_space<vmem>>, vector<1x8x32xf32>
    %96 = vector.shape_cast %95 : vector<1x8x32xf32> to vector<8x32xf32>
    %cst_63 = arith.constant dense<0.000000e+00> : vector<8x32xf32>
    %97 = tpu.matmul %94, %96, %cst_63 {dimension_numbers = #tpu.dot_dimension_numbers<[1], [0], [0], [1], [0, 0, 1, 1], [], []>} : vector<8x8xf32>, vector<8x32xf32>, vector<8x32xf32> -> vector<8x32xf32>
    %98 = arith.addf %75, %97 : vector<8x32xf32>
    %c3 = arith.constant 3 : index
    %c0_64 = arith.constant 0 : index
    %c0_65 = arith.constant 0 : index
    %99 = vector.load %arg6[%c3, %c0_64, %c0_65] : memref<4x32x8xf32, #tpu.memory_space<vmem>>, vector<1x32x8xf32>
    %100 = vector.shape_cast %99 : vector<1x32x8xf32> to vector<32x8xf32>
    %cst_66 = arith.constant dense<0.000000e+00> : vector<8x8xf32>
    %101 = tpu.matmul %28, %100, %cst_66 {dimension_numbers = #tpu.dot_dimension_numbers<[1], [0], [0], [1], [0, 0, 1, 1], [], []>} : vector<8x32xf32>, vector<32x8xf32>, vector<8x8xf32> -> vector<8x8xf32>
    %c3_67 = arith.constant 3 : index
    %c0_68 = arith.constant 0 : index
    %c0_69 = arith.constant 0 : index
    %102 = vector.load %arg18[%c3_67, %c0_68, %c0_69] : memref<4x8x8xf32, #tpu.memory_space<vmem>>, vector<1x8x8xf32>
    %103 = vector.shape_cast %102 : vector<1x8x8xf32> to vector<8x8xf32>
    %cst_70 = arith.constant dense<0.000000e+00> : vector<8x8xf32>
    %104 = tpu.matmul %101, %103, %cst_70 {dimension_numbers = #tpu.dot_dimension_numbers<[1], [1], [0], [0], [0, 0, 1, 0], [], []>} : vector<8x8xf32>, vector<8x8xf32>, vector<8x8xf32> -> vector<8x8xf32>
    %cst_71 = arith.constant dense<0xFF800000> : vector<8xf32>
    %105 = vector.multi_reduction <maximumf>, %104, %cst_71 [1] : vector<8x8xf32> to vector<8xf32>
    %106 = vector.shape_cast %105 : vector<8xf32> to vector<8x1xf32>
    %107 = vector.broadcast %106 : vector<8x1xf32> to vector<8x8xf32>
    %108 = arith.subf %104, %107 : vector<8x8xf32>
    %109 = math.exp %108 : vector<8x8xf32>
    %cst_72 = arith.constant dense<0.000000e+00> : vector<8xf32>
    %110 = vector.multi_reduction <add>, %109, %cst_72 [1] : vector<8x8xf32> to vector<8xf32>
    %111 = vector.shape_cast %110 : vector<8xf32> to vector<8x1xf32>
    %112 = tpu.reciprocal %111 {approx = true} : vector<8x1xf32> -> vector<8x1xf32>
    %113 = vector.broadcast %112 : vector<8x1xf32> to vector<8x8xf32>
    %114 = arith.mulf %109, %113 : vector<8x8xf32>
    %c3_73 = arith.constant 3 : index
    %c0_74 = arith.constant 0 : index
    %c0_75 = arith.constant 0 : index
    %115 = vector.load %arg19[%c3_73, %c0_74, %c0_75] : memref<4x8x8xf32, #tpu.memory_space<vmem>>, vector<1x8x8xf32>
    %116 = vector.shape_cast %115 : vector<1x8x8xf32> to vector<8x8xf32>
    %cst_76 = arith.constant dense<0.000000e+00> : vector<8x8xf32>
    %117 = tpu.matmul %114, %116, %cst_76 {dimension_numbers = #tpu.dot_dimension_numbers<[1], [0], [0], [1], [0, 0, 1, 1], [], []>} : vector<8x8xf32>, vector<8x8xf32>, vector<8x8xf32> -> vector<8x8xf32>
    %c3_77 = arith.constant 3 : index
    %c0_78 = arith.constant 0 : index
    %c0_79 = arith.constant 0 : index
    %118 = vector.load %arg9[%c3_77, %c0_78, %c0_79] : memref<4x8x32xf32, #tpu.memory_space<vmem>>, vector<1x8x32xf32>
    %119 = vector.shape_cast %118 : vector<1x8x32xf32> to vector<8x32xf32>
    %cst_80 = arith.constant dense<0.000000e+00> : vector<8x32xf32>
    %120 = tpu.matmul %117, %119, %cst_80 {dimension_numbers = #tpu.dot_dimension_numbers<[1], [0], [0], [1], [0, 0, 1, 1], [], []>} : vector<8x8xf32>, vector<8x32xf32>, vector<8x32xf32> -> vector<8x32xf32>
    %121 = arith.addf %98, %120 : vector<8x32xf32>
    %122 = arith.addf %6, %121 : vector<8x32xf32>
    %c0_81 = arith.constant 0 : index
    %c0_82 = arith.constant 0 : index
    %123 = vector.load %arg10[%c0_81, %c0_82] : memref<1x32xf32, #tpu.memory_space<vmem>>, vector<1x32xf32>
    %124 = vector.broadcast %123 : vector<1x32xf32> to vector<8x32xf32>
    %125 = arith.addf %122, %124 : vector<8x32xf32>
    %c0_83 = arith.constant 0 : index
    %c0_84 = arith.constant 0 : index
    %126 = vector.load %arg11[%c0_83, %c0_84] : memref<1x32xf32, #tpu.memory_space<vmem>>, vector<1x32xf32>
    %c0_85 = arith.constant 0 : index
    %c0_86 = arith.constant 0 : index
    %127 = vector.load %arg12[%c0_85, %c0_86] : memref<1x32xf32, #tpu.memory_space<vmem>>, vector<1x32xf32>
    %cst_87 = arith.constant dense<0.000000e+00> : vector<8xf32>
    %128 = vector.multi_reduction <add>, %125, %cst_87 [1] : vector<8x32xf32> to vector<8xf32>
    %129 = vector.shape_cast %128 : vector<8xf32> to vector<8x1xf32>
    %cst_88 = arith.constant 3.200000e+01 : f32
    %130 = vector.broadcast %cst_88 : f32 to vector<8x1xf32>
    %131 = arith.divf %129, %130 : vector<8x1xf32>
    %132 = vector.broadcast %131 : vector<8x1xf32> to vector<8x32xf32>
    %133 = arith.subf %125, %132 : vector<8x32xf32>
    %134 = arith.mulf %133, %133 : vector<8x32xf32>
    %cst_89 = arith.constant dense<0.000000e+00> : vector<8xf32>
    %135 = vector.multi_reduction <add>, %134, %cst_89 [1] : vector<8x32xf32> to vector<8xf32>
    %136 = vector.shape_cast %135 : vector<8xf32> to vector<8x1xf32>
    %cst_90 = arith.constant 3.200000e+01 : f32
    %137 = vector.broadcast %cst_90 : f32 to vector<8x1xf32>
    %138 = arith.divf %136, %137 : vector<8x1xf32>
    %139 = vector.broadcast %131 : vector<8x1xf32> to vector<8x32xf32>
    %140 = arith.subf %125, %139 : vector<8x32xf32>
    %cst_91 = arith.constant 9.99999974E-6 : f32
    %141 = vector.broadcast %cst_91 : f32 to vector<8x1xf32>
    %142 = arith.addf %138, %141 : vector<8x1xf32>
    %143 = math.rsqrt %142 : vector<8x1xf32>
    %144 = vector.broadcast %143 : vector<8x1xf32> to vector<8x32xf32>
    %145 = arith.mulf %140, %144 : vector<8x32xf32>
    %146 = vector.broadcast %126 : vector<1x32xf32> to vector<8x32xf32>
    %147 = arith.mulf %145, %146 : vector<8x32xf32>
    %148 = vector.broadcast %127 : vector<1x32xf32> to vector<8x32xf32>
    %149 = arith.addf %147, %148 : vector<8x32xf32>
    %c0_92 = arith.constant 0 : index
    %c0_93 = arith.constant 0 : index
    %150 = vector.load %arg13[%c0_92, %c0_93] : memref<32x128xf32, #tpu.memory_space<vmem>>, vector<32x128xf32>
    %cst_94 = arith.constant dense<0.000000e+00> : vector<8x128xf32>
    %151 = tpu.matmul %149, %150, %cst_94 {dimension_numbers = #tpu.dot_dimension_numbers<[1], [0], [0], [1], [0, 0, 1, 1], [], []>} : vector<8x32xf32>, vector<32x128xf32>, vector<8x128xf32> -> vector<8x128xf32>
    %c0_95 = arith.constant 0 : index
    %c0_96 = arith.constant 0 : index
    %152 = vector.load %arg14[%c0_95, %c0_96] : memref<1x128xf32, #tpu.memory_space<vmem>>, vector<1x128xf32>
    %153 = vector.broadcast %152 : vector<1x128xf32> to vector<8x128xf32>
    %154 = arith.addf %151, %153 : vector<8x128xf32>
    %cst_97 = arith.constant 5.000000e-01 : f32
    %155 = vector.broadcast %cst_97 : f32 to vector<8x128xf32>
    %156 = arith.mulf %155, %154 : vector<8x128xf32>
    %cst_98 = arith.constant 4.471500e-02 : f32
    %157 = vector.broadcast %cst_98 : f32 to vector<8x128xf32>
    %158 = arith.mulf %157, %154 : vector<8x128xf32>
    %159 = arith.mulf %158, %154 : vector<8x128xf32>
    %160 = arith.mulf %159, %154 : vector<8x128xf32>
    %161 = arith.addf %154, %160 : vector<8x128xf32>
    %cst_99 = arith.constant 0.797884583 : f32
    %162 = vector.broadcast %cst_99 : f32 to vector<8x128xf32>
    %163 = arith.mulf %162, %161 : vector<8x128xf32>
    %164 = math.tanh %163 : vector<8x128xf32>
    %cst_100 = arith.constant 1.000000e+00 : f32
    %165 = vector.broadcast %cst_100 : f32 to vector<8x128xf32>
    %166 = arith.addf %165, %164 : vector<8x128xf32>
    %167 = arith.mulf %156, %166 : vector<8x128xf32>
    %c0_101 = arith.constant 0 : index
    %c0_102 = arith.constant 0 : index
    %168 = vector.load %arg15[%c0_101, %c0_102] : memref<128x32xf32, #tpu.memory_space<vmem>>, vector<128x32xf32>
    %cst_103 = arith.constant dense<0.000000e+00> : vector<8x32xf32>
    %169 = tpu.matmul %167, %168, %cst_103 {dimension_numbers = #tpu.dot_dimension_numbers<[1], [0], [0], [1], [0, 0, 1, 1], [], []>} : vector<8x128xf32>, vector<128x32xf32>, vector<8x32xf32> -> vector<8x32xf32>
    %c0_104 = arith.constant 0 : index
    %c0_105 = arith.constant 0 : index
    %170 = vector.load %arg16[%c0_104, %c0_105] : memref<1x32xf32, #tpu.memory_space<vmem>>, vector<1x32xf32>
    %171 = vector.broadcast %170 : vector<1x32xf32> to vector<8x32xf32>
    %172 = arith.addf %169, %171 : vector<8x32xf32>
    %173 = arith.addf %125, %172 : vector<8x32xf32>
    %c0_106 = arith.constant 0 : index
    %c0_107 = arith.constant 0 : index
    %c0_108 = arith.constant 0 : index
    %174 = vector.load %arg17[%c0_106, %c0_107, %c0_108] : memref<1x8x32xf32, #tpu.memory_space<vmem>>, vector<1x8x32xf32>
    %175 = vector.shape_cast %174 : vector<1x8x32xf32> to vector<8x32xf32>
    %176 = vector.shape_cast %173 : vector<8x32xf32> to vector<1x8x32xf32>
    tpu.vector_store %arg17[%c0_106, %c0_107, %c0_108], %176 {strides = array<i32>} : memref<1x8x32xf32, #tpu.memory_space<vmem>>, vector<1x8x32xf32>,
    return
  }
  func.func @transform_0(%arg0: i32, %arg1: i32) -> (i32, i32, i32) {
    %c0_i32 = arith.constant 0 : i32
    %c0_i32_0 = arith.constant 0 : i32
    %c0_i32_1 = arith.constant 0 : i32
    return %arg0, %c0_i32, %c0_i32_0 : i32, i32, i32
  }
  func.func @transform_1(%arg0: i32, %arg1: i32) -> (i32, i32, i32) {
    %c0_i32 = arith.constant 0 : i32
    %c0_i32_0 = arith.constant 0 : i32
    return %arg0, %arg1, %c0_i32 : i32, i32, i32
  }
  func.func @transform_2(%arg0: i32, %arg1: i32) -> (i32, i32) {
    %c0_i32 = arith.constant 0 : i32
    %c0_i32_0 = arith.constant 0 : i32
    %c0_i32_1 = arith.constant 0 : i32
    return %c0_i32, %c0_i32_0 : i32, i32
  }
  func.func @transform_3(%arg0: i32, %arg1: i32) -> (i32, i32) {
    %c0_i32 = arith.constant 0 : i32
    %c0_i32_0 = arith.constant 0 : i32
    %c0_i32_1 = arith.constant 0 : i32
    return %c0_i32, %c0_i32_0 : i32, i32
  }
  func.func @transform_4(%arg0: i32, %arg1: i32) -> (i32, i32, i32) {
    %c0_i32 = arith.constant 0 : i32
    %c0_i32_0 = arith.constant 0 : i32
    %c0_i32_1 = arith.constant 0 : i32
    %c0_i32_2 = arith.constant 0 : i32
    return %c0_i32, %c0_i32_0, %c0_i32_1 : i32, i32, i32
  }
  func.func @transform_5(%arg0: i32, %arg1: i32) -> (i32, i32, i32) {
    %c0_i32 = arith.constant 0 : i32
    %c0_i32_0 = arith.constant 0 : i32
    %c0_i32_1 = arith.constant 0 : i32
    %c0_i32_2 = arith.constant 0 : i32
    return %c0_i32, %c0_i32_0, %c0_i32_1 : i32, i32, i32
  }
  func.func @transform_6(%arg0: i32, %arg1: i32) -> (i32, i32, i32) {
    %c0_i32 = arith.constant 0 : i32
    %c0_i32_0 = arith.constant 0 : i32
    %c0_i32_1 = arith.constant 0 : i32
    %c0_i32_2 = arith.constant 0 : i32
    return %c0_i32, %c0_i32_0, %c0_i32_1 : i32, i32, i32
  }
  func.func @transform_7(%arg0: i32, %arg1: i32) -> (i32, i32, i32) {
    %c0_i32 = arith.constant 0 : i32
    %c0_i32_0 = arith.constant 0 : i32
    %c0_i32_1 = arith.constant 0 : i32
    %c0_i32_2 = arith.constant 0 : i32
    return %c0_i32, %c0_i32_0, %c0_i32_1 : i32, i32, i32
  }
  func.func @transform_8(%arg0: i32, %arg1: i32) -> (i32, i32) {
    %c0_i32 = arith.constant 0 : i32
    %c0_i32_0 = arith.constant 0 : i32
    %c0_i32_1 = arith.constant 0 : i32
    return %c0_i32, %c0_i32_0 : i32, i32
  }
  func.func @transform_9(%arg0: i32, %arg1: i32) -> (i32, i32) {
    %c0_i32 = arith.constant 0 : i32
    %c0_i32_0 = arith.constant 0 : i32
    %c0_i32_1 = arith.constant 0 : i32
    return %c0_i32, %c0_i32_0 : i32, i32
  }
  func.func @transform_10(%arg0: i32, %arg1: i32) -> (i32, i32) {
    %c0_i32 = arith.constant 0 : i32
    %c0_i32_0 = arith.constant 0 : i32
    %c0_i32_1 = arith.constant 0 : i32
    return %c0_i32, %c0_i32_0 : i32, i32
  }
  func.func @transform_11(%arg0: i32, %arg1: i32) -> (i32, i32) {
    %c0_i32 = arith.constant 0 : i32
    %c0_i32_0 = arith.constant 0 : i32
    %c0_i32_1 = arith.constant 0 : i32
    return %c0_i32, %c0_i32_0 : i32, i32
  }
  func.func @transform_12(%arg0: i32, %arg1: i32) -> (i32, i32) {
    %c0_i32 = arith.constant 0 : i32
    %c0_i32_0 = arith.constant 0 : i32
    %c0_i32_1 = arith.constant 0 : i32
    return %c0_i32, %c0_i32_0 : i32, i32
  }
  func.func @transform_13(%arg0: i32, %arg1: i32) -> (i32, i32) {
    %c0_i32 = arith.constant 0 : i32
    %c0_i32_0 = arith.constant 0 : i32
    %c0_i32_1 = arith.constant 0 : i32
    return %c0_i32, %c0_i32_0 : i32, i32
  }
  func.func @transform_14(%arg0: i32, %arg1: i32) -> (i32, i32) {
    %c0_i32 = arith.constant 0 : i32
    %c0_i32_0 = arith.constant 0 : i32
    %c0_i32_1 = arith.constant 0 : i32
    return %c0_i32, %c0_i32_0 : i32, i32
  }
  func.func @transform_15(%arg0: i32, %arg1: i32) -> (i32, i32, i32) {
    %c0_i32 = arith.constant 0 : i32
    %c0_i32_0 = arith.constant 0 : i32
    return %arg0, %arg1, %c0_i32 : i32, i32, i32
  }
}

</mosaic_0001>

<bundles_post_ra>
// kernel: tpu_custom_call.1
= control target key start
LH: loop header
LB: loop body
LE: loop exit
PB: predicated region body
PF: predicated region fallthrough
CT: control target
= control target key end

     0   :  { %s4116_s0 = inlined_call_operand.vmem [shape: f32[2,8,32], index: 0, kind: input, shape index: {}]   ;;  %s4117_s1 = inlined_call_operand.vmem [shape: f32[2,8,32], index: 1, kind: input, shape index: {}]   ;;  %s4118_s2 = inlined_call_operand.vmem [shape: f32[1,32], index: 2, kind: input, shape index: {}]   ;;  %s4119_s3 = inlined_call_operand.vmem [shape: f32[1,32], index: 3, kind: input, shape index: {}]   ;;  %s4120_s4 = inlined_call_operand.vmem [shape: f32[4,32,8], index: 4, kind: input, shape index: {}]   ;;  %s4121_s5 = inlined_call_operand.vmem [shape: f32[4,32,8], index: 5, kind: input, shape index: {}]   ;;  %s4122_s6 = inlined_call_operand.vmem [shape: f32[4,32,8], index: 6, kind: input, shape index: {}]   ;;  %s4123_s7 = inlined_call_operand.vmem [shape: f32[4,8,32], index: 7, kind: input, shape index: {}]   ;;  %s4124_s8 = inlined_call_operand.vmem [shape: f32[1,32], index: 8, kind: input, shape index: {}]   ;;  %s4125_s9 = inlined_call_operand.vmem [shape: f32[1,32], index: 9, kind: input, shape index: {}]   ;;  %s4126_s10 = inlined_call_operand.vmem [shape: f32[1,32], index: 10, kind: input, shape index: {}]   ;;  %s4127_s11 = inlined_call_operand.vmem [shape: f32[32,128], index: 11, kind: input, shape index: {}]   ;;  %s4128_s12 = inlined_call_operand.vmem [shape: f32[1,128], index: 12, kind: input, shape index: {}]   ;;  %s4129_s13 = inlined_call_operand.vmem [shape: f32[128,32], index: 13, kind: input, shape index: {}]   ;;  %s4130_s14 = inlined_call_operand.vmem [shape: f32[1,32], index: 14, kind: input, shape index: {}]   ;;  %s4131_s15 = inlined_call_operand.hbm [shape: f32[2,8,32], index: 15, kind: output, shape index: {}]  }
   0x1   :  { %4136 = sst [smem:[#allocation10_spill]] %s4116_s0 }
   0x2   :  { %4137 = sst [smem:[#allocation11_spill]] %s4117_s1 }
   0x3   :  { %4138 = sst [smem:[#allocation12_spill]] %s4118_s2 }
   0x4   :  { %4139 = sst [smem:[#allocation13_spill]] %s4131_s15 }
   0x5   :  { %20 = vsyncpa [#allocation5], 0 }
   0x6   :  { %22 = vsyncpa [#allocation5 + $0x1], 0  ;;  %s3575_s18 = smov 0   ;;  %s3577_s19 = smov 0  }
   0x7   :  { %s3579_s20 = smov 0   ;;  %s3581_s21 = smov 0  }
   0x8   :  { %s3583_s22 = smov 0   ;;  %s3585_s23 = smov 0  }
   0x9 LB: > { %4140 = sst [smem:[#allocation7_spill]] %s3469_s18  ;;  %s2796_s24 = sadd.s32 4294967295, %s3489_s23   ;;  %s3489_s23 = sphi %s3585_s23, %s28_s23   ;;  %s3485_s22 = sphi %s3583_s22, %s4151_s22   ;;  %s3481_s21 = sphi %s3581_s21, %s4150_s21   ;;  %s3477_s20 = sphi %s3579_s20, %s4154_s20   ;;  %s3473_s19 = sphi %s3577_s19, %s4153_s19   ;;  %s3469_s18 = sphi %s3575_s18, %s4152_s18  }
   0xa   : > { %4141 = sst [smem:[#allocation8_spill]] %s3485_s22  ;;  %s2797_s25 = sadd.s32 4294967294, %s3489_s23  }
   0xb   : > { %s40_s26 = sadd.s32 1, %s3485_s22  ;;  %s376_s27 = sadd.s32 1, %s3477_s20 }
   0xc   : > { %p42_p0 = scmp.ge.s32.totalorder %s40_s26, 2  ;;  %p386_p1 = scmp.ne.s32.totalorder %s3477_s20, %s3473_s19 }
   0xd   : > { %p387_p2 = scmp.eq.s32.totalorder %s2796_s24, 1  ;;  %p392_p3 = scmp.ne.s32.totalorder %s3473_s19, %s3469_s18 }
   0xe   : > { %s4156_s26 = smov (%p42_p0, %s40_s26), 0  ;;  %p393_p5 = scmp.eq.s32.totalorder %s2797_s25, 1 }
   0xf   : > { %4142 = sst [smem:[#allocation9_spill]] %s4156_s26  ;;  %p3615_p4 = por %p387_p2, %p386_p1 }
  0x10   : > { %s371_s29 = ssub.s32 %s3485_s22, %s4156_s26  ;;  %p2800_p6 = scmp.ge.s32.totalorder %s3489_s23, 1 }
  0x11   : > { %p374_p7 = scmp.eq.s32.totalorder %s371_s29, 0  ;;  %p3622_p8 = por %p393_p5, %p392_p3 }
  0x12   : > { %p467_p9 = scmp.lt.s32.totalorder %s3489_s23, 3 }
  0x13   : > { %s3628_s16 = scalar_select %p374_p7, %s3477_s20, %s376_s27  }
  0x14   : > { %p468_p10 = pnand %p2800_p6, %p467_p9 }
  0x15   : > { %p521_p11 = scmp.lt.s32.totalorder (!%p468_p10), %s3481_s21, 1  ;;  %vm539_vm0 = vcmask (!%p468_p10), 261120   ;;  %s4145_s0 = sld [smem:[#allocation10_spill]] (!%p468_p10)  ;;  %v568_v14 = vld [vmem:[%s4121_s5] sm:$0xff] (!%p468_p10)  ;;  %v569_v15 = vld [vmem:[%s4121_s5 + $0x8] sm:$0xff] (!%p468_p10)  ;;  %v3491_v19 = vmov (!%p468_p10), 0.0|0.0  }
  0x16   : > { %471 = sbr.rel (%p468_p10) target bundleno = 4571 (0x11db), region = 80  ;;  %s4146_s1 = sld [smem:[#allocation11_spill]] (!%p468_p10)  ;;  %v2811_v16 = vld [vmem:[%s4122_s6 + $0x20] sm:$0xff] (!%p468_p10)  ;;  %v3228_v17 = vpack.c.bf16 (!%p468_p10), %v569_v15, %v568_v14  ;;  %v2812_v18 = vld [vmem:[%s4122_s6 + $0x28] sm:$0xff] (!%p468_p10)  ;;  %3227 = vmatprep.subr.bf16.mxu0 (!%p468_p10), %v3491_v19  ;;  %3245 = vmatprep.subr.bf16.mxu1 (!%p468_p10), %v3491_v19  ;;  %v570_v21 = vld [vmem:[%s4121_s5 + $0x10] sm:$0xff] (!%p468_p10)  ;;  %vm3492_vm1 = vmmov (!%p468_p10), 0  }
  0x17   : > { %v3246_v20 = vpack.c.bf16 (!%p468_p10), %v2812_v18, %v2811_v16  ;;  %v571_v22 = vld [vmem:[%s4121_s5 + $0x18] sm:$0xff] (!%p468_p10)  ;;  %v2813_v23 = vld [vmem:[%s4122_s6 + $0x30] sm:$0xff] (!%p468_p10)  ;;  %v3493_v27 = vmov (!%p468_p10), 0.0   ;;  %s4147_s2 = sld [smem:[#allocation12_spill]] (!%p468_p10)  ;;  %v647_v33 = vld [vmem:[%s4122_s6] sm:$0xff] (!%p468_p10)  ;;  %vm645_vm2 = vcmask (!%p468_p10), 64512  }
  0x18   : > { %3229 = vmatpush3.bf16.msra.mxu0 (!%p468_p10), %v3228_v17  ;;  %v3231_v24 = vpack.c.bf16 (!%p468_p10), %v571_v22, %v570_v21  ;;  %v2814_v25 = vld [vmem:[%s4122_s6 + $0x38] sm:$0xff] (!%p468_p10)  ;;  %2997 = vmatprep.mubr.msk.f32.mxu0 (!%p468_p10), %vm3492_vm1, %v3493_v27  ;;  %v648_v35 = vld [vmem:[%s4122_s6 + $0x8] sm:$0xff] (!%p468_p10)  ;;  %v2821_v36 = vld [vmem:[%s4122_s6 + $0x40] sm:$0xff] (!%p468_p10)  ;;  %s518_s25 = sand.u32 (!%p468_p10), 1, %s3473_s19   ;;  %s2878_s22 = sshll.u32 (!%p468_p10), %s3481_s21, 7 }
  0x19   : > { %3247 = vmatpush3.bf16.msra.mxu1 (!%p468_p10), %v3246_v20  ;;  %3230 = vmatprep.subr.bf16.mxu0 (!%p468_p10), %v3491_v19  ;;  %v3249_v26 = vpack.c.bf16 (!%p468_p10), %v2814_v25, %v2813_v23  ;;  %v2822_v37 = vld [vmem:[%s4122_s6 + $0x48] sm:$0xff] (!%p468_p10)  ;;  %v3704_v38 = vld [vmem:[%s4119_s3] ss:$0 sm:$0xff] (!%p468_p10)  ;;  %v3234_v40 = vpack.c.bf16 (!%p468_p10), %v648_v35, %v647_v33  ;;  %v649_v42 = vld [vmem:[%s4122_s6 + $0x10] sm:$0xff] (!%p468_p10)  ;;  %s2801_s29 = sshll.u32 (!%p468_p10), %s518_s25, 3 }
  0x1a   : > { %3248 = vmatprep.subr.bf16.mxu1 (!%p468_p10), %v3491_v19  ;;  %3030 = vmatprep.mubr.msk.f32.mxu1 (!%p468_p10), %vm3492_vm1, %v3493_v27  ;;  %v3258_v41 = vpack.c.bf16 (!%p468_p10), %v2822_v37, %v2821_v36  ;;  %v650_v44 = vld [vmem:[%s4122_s6 + $0x18] sm:$0xff] (!%p468_p10)  ;;  %v2823_v45 = vld [vmem:[%s4122_s6 + $0x50] sm:$0xff] (!%p468_p10)  ;;  %v2806_v49 = vld [vmem:[%s4121_s5 + $0x20] sm:$0xff] (!%p468_p10) }
  0x1b   : > { %v2824_v46 = vld [vmem:[%s4122_s6 + $0x58] sm:$0xff] (!%p468_p10)  ;;  %v3237_v47 = vpack.c.bf16 (!%p468_p10), %v650_v44, %v649_v42  ;;  %v2807_v50 = vld [vmem:[%s4121_s5 + $0x28] sm:$0xff] (!%p468_p10)  ;;  %v2831_v51 = vld [vmem:[%s4122_s6 + $0x60] sm:$0xff] (!%p468_p10) }
  0x1c   : > { %3232 = vmatpush3.bf16.msra.mxu0 (!%p468_p10), %v3231_v24  ;;  %v3261_v48 = vpack.c.bf16 (!%p468_p10), %v2824_v46, %v2823_v45  ;;  %v2832_v52 = vld [vmem:[%s4122_s6 + $0x68] sm:$0xff] (!%p468_p10)  ;;  %v3240_v53 = vpack.c.bf16 (!%p468_p10), %v2807_v50, %v2806_v49  ;;  %v2808_v55 = vld [vmem:[%s4121_s5 + $0x30] sm:$0xff] (!%p468_p10)  ;;  %v2809_v57 = vld [vmem:[%s4121_s5 + $0x38] sm:$0xff] (!%p468_p10) }
  0x1d   : > { %s522_s17 = scalar_select %p521_p11, %s3481_s21, 1  ;;  %3250 = vmatpush3.bf16.msra.mxu1 %v3249_v26  ;;  %3233 = vmatprep.subr.bf16.mxu0 %v3491_v19  ;;  %v3687_v32 = vld [vmem:[%s4147_s2] ss:$0 sm:$0xff]  ;;  %v3270_v54 = vpack.c.bf16 %v2832_v52, %v2831_v51  ;;  %v2833_v58 = vld [vmem:[%s4122_s6 + $0x70] sm:$0xff]  ;;  %v2834_v59 = vld [vmem:[%s4122_s6 + $0x78] sm:$0xff]  ;;  %v3243_v61 = vpack.c.bf16 %v2809_v57, %v2808_v55 }
  0x1e   : > { %3257 = vmatprep.subr.bf16.mxu1 %v3491_v19  ;;  %v3273_v62 = vpack.c.bf16 %v2834_v59, %v2833_v58  ;;  %v2816_v63 = vld [vmem:[%s4121_s5 + $0x40] sm:$0xff]  ;;  %v1215_v15 = vld [vmem:[%s4120_s4 + $0x8] sm:$0xff]  ;;  %v1216_v20 = vld [vmem:[%s4120_s4 + $0x10] sm:$0xff] }
  0x1f   : > { %s2802_s24 = sshll.u32 %s522_s17, 3  ;;  %v1214_v14 = vld [vmem:[%s4120_s4] sm:$0xff]  ;;  %v1217_v21 = vld [vmem:[%s4120_s4 + $0x18] sm:$0xff]  ;;  %v2841_v44 = vld [vmem:[%s4120_s4 + $0x28] sm:$0xff] }
  0x20   : > { %s524_s26 = scalar_lea.vmem %s4145_s0, %s2802_s24  ;;  %s531_s15 = scalar_lea.vmem %s4146_s1, %s2802_s24  ;;  %v3276_v17 = vpack.c.bf16 %v1215_v15, %v1214_v14  ;;  %v3279_v22 = vpack.c.bf16 %v1217_v21, %v1216_v20  ;;  %v2842_v46 = vld [vmem:[%s4120_s4 + $0x30] sm:$0xff]  ;;  %v2848_v14 = vld [vmem:[%s4123_s7 + $0x8] sm:$0xff]  ;;  %v2851_v21 = vld [vmem:[%s4120_s4 + $0x40] sm:$0xff] }
  0x21   : > { %v538_v0 = vld [vmem:[%s524_s26] sm:$0xff]  ;;  %s520_s26 = scalar_lea.vmem [#allocation4], %s2801_s29  ;;  %s4148_s24 = sld [smem:[#allocation13_spill]] }
  0x22   : > { %v3638_v1 = vld [vmem:[%s531_s15] sm:$0xff]  ;;  %v540_v2 = vsel %vm539_vm0, %v538_v0, 0.0  ;;  %s2713_s0 = sshll.u32 %s520_s26, 4  ;;  %s2699_s15 = scalar_lea.sflag [#allocation5], %s518_s25  ;;  %s4070_s0 = int_to_ptr.vmem [resolvable:$true] %s2713_s0 }
  0x23   : > { %541 = vadd.xlane.f32.xlu0 %v540_v2  ;;  %v1186_v3 = vsel %vm539_vm0, %v3638_v1, 0.0  ;;  %s3411_s21 = scalar_lea.vmem %s4070_s0, 128  ;;  %s3494_s29 = smov [#allocation4]  }
  0x24   : > { %p3412_p12 = scmp.ne.s32.totalorder %s4070_s0, %s3411_s21  ;;  %s3415_s18 = sshll.u32 %s3494_s29, 4  ;;  %s3416_s18 = int_to_ptr.vmem [resolvable:$false] %s3415_s18 }
  0x25   : > { %s3417_s2 = scalar_lea.vmem %s3416_s18, 256  ;;  %p3418_p1 = scmp.lt.s32.totalorder %s4070_s0, %s3416_s18 }
  0x26   : > { %p3413_p13 = pnand %p3412_p12, %p3615_p4  ;;  %p3419_p2 = scmp.lt.s32.totalorder %s3417_s2, %s3411_s21 }
  0x27   : > { %1187 = vadd.xlane.f32.xlu0 %v1186_v3  ;;  %s4068_s1 = scalar_lea.hbm %s4148_s24, %s2878_s22 }
  0x28   : > { %p3414_p0 = pneg %p3413_p13  ;;  %p3420_p3 = por %p3419_p2, %p3418_p1 }
  0x2a   : > { %p3421_p5 = pnand %p3420_p3, %p3414_p0 }
  0xb0   : > { %v542_v4 = vpop.xlane.xlu0 %541 }
  0xb1   : > { %v544_v5 = vmul.f32 0.03125, %v542_v4  ;;  %v2818_v4 = vld [vmem:[%s4121_s5 + $0x50] sm:$0xff] }
  0xb3   : > { %v545_v6 = vsub.f32 %v538_v0, %v544_v5  ;;  %v2817_v0 = vld [vmem:[%s4121_s5 + $0x48] sm:$0xff]  ;;  %v2819_v5 = vld [vmem:[%s4121_s5 + $0x58] sm:$0xff] }
  0xb4   : > { %v1188_v7 = vpop.xlane.xlu0 %1187  ;;  %v3252_v3 = vpack.c.bf16 %v2817_v0, %v2816_v63 }
  0xb5   : > { %v1190_v8 = vmul.f32 0.03125, %v1188_v7  ;;  %v546_v9 = vmul.f32 %v545_v6, %v545_v6  ;;  %v2826_v7 = vld [vmem:[%s4121_s5 + $0x60] sm:$0xff] }
  0xb7   : > { %v3644_v10 = vsub.f32 %v3638_v1, %v1190_v8  ;;  %v547_v11 = vsel %vm539_vm0, %v546_v9, 0.0  ;;  %v2827_v8 = vld [vmem:[%s4121_s5 + $0x68] sm:$0xff] }
  0xb8   : > { %548 = vadd.xlane.f32.xlu1 %v547_v11  ;;  %v3264_v9 = vpack.c.bf16 %v2827_v8, %v2826_v7  ;;  %v2828_v11 = vld [vmem:[%s4121_s5 + $0x70] sm:$0xff] }
  0xb9   : > { %v1192_v12 = vmul.f32 %v3644_v10, %v3644_v10 }
  0xbb   : > { %v1193_v13 = vsel %vm539_vm0, %v1192_v12, 0.0  ;;  %v2829_v12 = vld [vmem:[%s4121_s5 + $0x78] sm:$0xff] }
  0xbc   : > { %1194 = vadd.xlane.f32.xlu1 %v1193_v13  ;;  %v3267_v13 = vpack.c.bf16 %v2829_v12, %v2828_v11 }
 0x145   : > { %v549_v28 = vpop.xlane.xlu1 %548 }
 0x146   : > { %v550_v29 = vmul.f32 0.03125, %v549_v28 }
 0x148   : > { %v551_v30 = vadd.f32 1e-05, %v550_v29 }
 0x149   : > { %v1195_v56 = vpop.xlane.xlu1 %1194 }
 0x14a   : > { %3387 = vrsqrt.f32 %v551_v30  ;;  %v1196_v60 = vmul.f32 0.03125, %v1195_v56 }
 0x14c   : > { %v1197_v2 = vadd.f32 1e-05, %v1196_v60 }
 0x14e   : > { %3389 = vrsqrt.f32 %v1197_v2 }
 0x154   : > { %v3388_v31 = vpop.eup %3387 }
 0x155   : > { %v553_v34 = vmul.f32 %v3388_v31, %v545_v6  ;;  %v3255_v6 = vpack.c.bf16 %v2819_v5, %v2818_v4 }
 0x157   : > { %v560_v39 = vmul.f32 %v3687_v32, %v553_v34 }
 0x158   : > { %v3390_v16 = vpop.eup %3389 }
 0x159   : > { %v3711_v43 = vadd.f32 %v3704_v38, %v560_v39  ;;  %v1199_v18 = vmul.f32 %v3390_v16, %v3644_v10 }
 0x15b   : > { %2998 = vmatmul.mubr.msk.f32.vlgmr.msra.gmra.mrb[0].mxu0 %vm539_vm0, %v3711_v43  ;;  %3031 = vmatmul.mubr.msk.f32.vlgmr.msra.gmra.mrb[0].mxu1 %vm539_vm0, %v3711_v43  ;;  %v1206_v10 = vmul.f32 %v3687_v32, %v1199_v18  ;;  %v1454_v18 = vld [vmem:[%s4123_s7] sm:$0xff] }
 0x15c   : > { %3235 = vmatpush3.bf16.msra.mxu0 %v3234_v40  ;;  %3259 = vmatpush3.bf16.msra.mxu1 %v3258_v41 }
 0x15d   : > { %3236 = vmatprep.subr.bf16.mxu0 %v3491_v19  ;;  %3260 = vmatprep.subr.bf16.mxu1 %v3491_v19  ;;  %v3830_v23 = vadd.f32 %v3704_v38, %v1206_v10 }
 0x15e   : > { %3008 = vmatprep.mubr.msk.f32.mxu0 %vm3492_vm1, %v3493_v27  ;;  %3052 = vmatprep.mubr.msk.f32.mxu1 %vm3492_vm1, %v3493_v27 }
 0x160   : > { %3238 = vmatpush3.bf16.msra.mxu0 %v3237_v47  ;;  %3262 = vmatpush3.bf16.msra.mxu1 %v3261_v48  ;;  %v2843_v47 = vld [vmem:[%s4120_s4 + $0x38] sm:$0xff] }
 0x161   : > { %3239 = vmatprep.subr.bf16.mxu0 %v3491_v19  ;;  %3269 = vmatprep.subr.bf16.mxu1 %v3491_v19  ;;  %v3285_v50 = vpack.c.bf16 %v2843_v47, %v2842_v46  ;;  %v2859_v46 = vld [vmem:[%s4123_s7 + $0x10] sm:$0xff] }
 0x163   : > { %3009 = vmatmul.mubr.msk.f32.vlgmr.msra.gmra.mrb[2].mxu0 %vm539_vm0, %v3711_v43  ;;  %3053 = vmatmul.mubr.msk.f32.vlgmr.msra.gmra.mrb[2].mxu1 %vm539_vm0, %v3711_v43 }
 0x164   : > { %3241 = vmatpush3.bf16.msra.mxu0 %v3240_v53  ;;  %3271 = vmatpush3.bf16.msra.mxu1 %v3270_v54 }
 0x165   : > { %3242 = vmatprep.subr.bf16.mxu0 %v3491_v19  ;;  %3272 = vmatprep.subr.bf16.mxu1 %v3491_v19 }
 0x166   : > { %3019 = vmatprep.mubr.msk.f32.mxu0 %vm3492_vm1, %v3493_v27  ;;  %3074 = vmatprep.mubr.msk.f32.mxu1 %vm3492_vm1, %v3493_v27 }
 0x168   : > { %3244 = vmatpush3.bf16.msra.mxu0 %v3243_v61  ;;  %3274 = vmatpush3.bf16.msra.mxu1 %v3273_v62 }
 0x169   : > { %3251 = vmatprep.subr.bf16.mxu0 %v3491_v19  ;;  %3093 = vmatprep.subr.mxu1 %v3493_v27 }
 0x16b   : > { %3020 = vmatmul.mubr.msk.f32.vlgmr.msra.gmra.mrb[4].mxu0 %vm539_vm0, %v3711_v43  ;;  %3075 = vmatmul.mubr.msk.f32.vlgmr.msra.gmra.mrb[4].mxu1 %vm539_vm0, %v3711_v43 }
 0x16c   : > { %3253 = vmatpush3.bf16.msra.mxu0 %v3252_v3  ;;  %3041 = vmatprep.mubr.msk.f32.mxu0 %vm3492_vm1, %v3493_v27 }
 0x16d   : > { %3254 = vmatprep.subr.bf16.mxu0 %v3491_v19  ;;  %3095 = vmatprep.mubr.msk.f32.mxu1 %vm3492_vm1, %v3493_v27 }
 0x170   : > { %3256 = vmatpush3.bf16.msra.mxu0 %v3255_v6 }
 0x171   : > { %3263 = vmatprep.subr.bf16.mxu0 %v3491_v19 }
 0x173   : > { %3042 = vmatmul.mubr.msk.f32.vlgmr.msra.gmra.mrb[6].mxu0 %vm539_vm0, %v3711_v43 }
 0x174   : > { %3265 = vmatpush3.bf16.msra.mxu0 %v3264_v9  ;;  %3063 = vmatprep.mubr.msk.f32.mxu0 %vm3492_vm1, %v3493_v27 }
 0x175   : > { %3266 = vmatprep.subr.bf16.mxu0 %v3491_v19 }
 0x178   : > { %3268 = vmatpush3.bf16.msra.mxu0 %v3267_v13 }
 0x179   : > { %3275 = vmatprep.subr.bf16.mxu0 %v3491_v19 }
 0x17b   : > { %3064 = vmatmul.mubr.msk.f32.vlgmr.msra.gmra.mrb[8].mxu0 %vm539_vm0, %v3711_v43  ;;  %v2840_v43 = vld [vmem:[%s4120_s4 + $0x20] sm:$0xff] }
 0x17c   : > { %3277 = vmatpush3.bf16.msra.mxu0 %v3276_v17  ;;  %3085 = vmatprep.mubr.msk.f32.mxu0 %vm3492_vm1, %v3493_v27  ;;  %v3282_v45 = vpack.c.bf16 %v2841_v44, %v2840_v43 }
 0x17d   : > { %3278 = vmatprep.subr.bf16.mxu0 %v3491_v19 }
 0x180   : > { %3280 = vmatpush3.bf16.msra.mxu0 %v3279_v22  ;;  %v2852_v22 = vld [vmem:[%s4120_s4 + $0x48] sm:$0xff] }
 0x181   : > { %3088 = vmatprep.subr.mxu0 %v3493_v27  ;;  %v3288_v10 = vpack.c.bf16 %v2852_v22, %v2851_v21 }
 0x183   : > { %3086 = vmatmul.mubr.msk.f32.vlgmr.msra.gmra.mrb[10].mxu0 %vm539_vm0, %v3830_v23 }
 0x184   : > { %3090 = vmatprep.mubr.msk.f32.mxu0 %vm3492_vm1, %v3493_v27 }
 0x22e   : > { %v641_v24 = vpop.f32.mrb[0].mxu0  ;;  %v870_v25 = vpop.f32.mrb[0].mxu1 }
 0x22f   : > { %646 = vst.msk [vmem:[#allocation2] sm:$0xff] %vm645_vm2, %v641_v24  ;;  %875 = vst.msk [vmem:[#allocation3 + $0x8] sm:$0xff] %vm645_vm2, %v870_v25  ;;  %v2999_v26 = vpop.f32.mrb[1].mxu0  ;;  %v3032_v28 = vpop.f32.mrb[1].mxu1  ;;  %v2853_v24 = vld [vmem:[%s4120_s4 + $0x50] sm:$0xff]  ;;  %v2854_v25 = vld [vmem:[%s4120_s4 + $0x58] sm:$0xff] }
 0x236   : > { %v717_v29 = vpop.f32.mrb[2].mxu0  ;;  %v1024_v30 = vpop.f32.mrb[2].mxu1  ;;  %v1291_v31 = vld [vmem:[#allocation2] sm:$0xff]  ;;  %v1620_v2 = vld [vmem:[#allocation3 + $0x8] sm:$0xff] }
 0x237   : > { %721 = vst.msk [vmem:[#allocation3] sm:$0xff] %vm645_vm2, %v717_v29  ;;  %1029 = vst.msk [vmem:[#allocation3 + $0x10] sm:$0xff] %vm645_vm2, %v1024_v30  ;;  %v3010_v32 = vpop.f32.mrb[3].mxu0  ;;  %v3054_v33 = vpop.f32.mrb[3].mxu1  ;;  %3089 = vmatpush3.xpose.msk.msra.mxu0 %vm645_vm2, %v1291_v31  ;;  %v3291_v29 = vpack.c.bf16 %v2854_v25, %v2853_v24 }
 0x238   : > { %3281 = vmatprep.subr.bf16.mxu0 %v3491_v19 }
 0x23e   : > { %v793_v34 = vpop.f32.mrb[4].mxu0  ;;  %v1178_v35 = vpop.f32.mrb[4].mxu1  ;;  %v1380_v36 = vld [vmem:[#allocation3] sm:$0xff] }
 0x23f   : > { %798 = vst.msk [vmem:[#allocation2 + $0x8] sm:$0xff] %vm645_vm2, %v793_v34  ;;  %1183 = vst.msk [vmem:[#allocation3 + $0x18] sm:$0xff] %vm645_vm2, %v1178_v35  ;;  %v3021_v37 = vpop.f32.mrb[5].mxu0  ;;  %v3076_v38 = vpop.f32.mrb[5].mxu1  ;;  %3094 = vmatpush3.msra.mxu1 %v1380_v36 }
 0x240   : > { %3109 = vmatprep.subr.mxu1 %v3493_v27  ;;  %v2007_v37 = vld [vmem:[#allocation3 + $0x10] sm:$0xff] }
 0x246   : > { %v947_v39 = vpop.f32.mrb[6].mxu0  ;;  %v1531_v0 = vld [vmem:[#allocation2 + $0x8] sm:$0xff] }
 0x247   : > { %952 = vst.msk [vmem:[#allocation2 + $0x10] sm:$0xff] %vm645_vm2, %v947_v39  ;;  %v3043_v40 = vpop.f32.mrb[7].mxu0 }
 0x24e   : > { %v1101_v41 = vpop.f32.mrb[8].mxu0  ;;  %v1918_v20 = vld [vmem:[#allocation2 + $0x10] sm:$0xff] }
 0x24f   : > { %1106 = vst.msk [vmem:[#allocation2 + $0x18] sm:$0xff] %vm645_vm2, %v1101_v41  ;;  %v3065_v42 = vpop.f32.mrb[9].mxu0 }
 0x256   : > { %v1287_v48 = vpop.f32.mrb[10].mxu0 }
 0x257   : > { %v3087_v49 = vpop.f32.mrb[11].mxu0  ;;  %3091 = vmatmul.mubr.msk.f32.vlgmr.msra.gmra.mrb[12].mxu0 %vm645_vm2, %v1287_v48  ;;  %v2861_v48 = vld [vmem:[%s4120_s4 + $0x60] sm:$0xff] }
 0x258   : > { %3283 = vmatpush3.bf16.msra.mxu0 %v3282_v45  ;;  %3106 = vmatprep.mubr.msk.f32.mxu0 %vm3492_vm1, %v3493_v27  ;;  %v2862_v49 = vld [vmem:[%s4120_s4 + $0x68] sm:$0xff] }
 0x259   : > { %3284 = vmatprep.subr.bf16.mxu0 %v3491_v19 }
 0x25c   : > { %3286 = vmatpush3.bf16.msra.mxu0 %v3285_v50 }
 0x25d   : > { %3119 = vmatprep.subr.mxu0 %v3493_v27 }
 0x25f   : > { %3107 = vmatmul.mubr.msk.f32.vlgmr.msra.gmra.mrb[14].mxu0 %vm539_vm0, %v3830_v23 }
 0x260   : > { %3121 = vmatprep.mubr.msk.f32.mxu0 %vm3492_vm1, %v3493_v27  ;;  %3120 = vmatpush3.msra.mxu0 %v2848_v14 }
 0x261   : > { %3287 = vmatprep.subr.bf16.mxu0 %v3491_v19 }
 0x32a   : > { %v1365_v51 = vpop.f32.mrb[12].mxu0 }
 0x32b   : > { %v3092_v52 = vpop.f32.mrb[13].mxu0  ;;  %v1369_v53 = vsel %vm645_vm2, %v1365_v51, -inf }
 0x32c   : > { %1370 = vmax.xlane.f32.xlu0 %v1369_v53  ;;  %v2863_v53 = vld [vmem:[%s4120_s4 + $0x70] sm:$0xff] }
 0x332   : > { %v1526_v54 = vpop.f32.mrb[14].mxu0 }
 0x333   : > { %v3108_v55 = vpop.f32.mrb[15].mxu0 }
 0x3b9   : > { %v1371_v56 = vpop.xlane.xlu0 %1370 }
 0x3ba   : > { %v1372_v57 = vsub.f32 %v1365_v51, %v1371_v56  ;;  %v3294_v51 = vpack.c.bf16 %v2862_v49, %v2861_v48  ;;  %v2607_v49 = vld [vmem:[%s4129_s13 + $0x20] sm:$0xff] }
 0x3bc   : > { %v1373_v58 = vmul.f32 1.442695, %v1372_v57 }
 0x3be   : > { %3391 = vpow2.f32 %v1373_v58  ;;  %v2233_v58 = vld [vmem:[#allocation2 + $0x18] sm:$0xff] }
 0x3c8   : > { %v3392_v59 = vpop.eup %3391 }
 0x3c9   : > { %v1375_v60 = vsel %vm645_vm2, %v3392_v59, 0.0 }
 0x3ca   : > { %1376 = vadd.xlane.f32.xlu1 %v1375_v60 }
 0x457   : > { %v1377_v61 = vpop.xlane.xlu1 %1376 }
 0x458   : > { %3393 = vrcp.f32 %v1377_v61 }
 0x462   : > { %v3394_v62 = vpop.eup %3393 }
 0x463   : > { %v1379_v63 = vmul.f32 %v3394_v62, %v3392_v59 }
 0x465   : > { %3096 = vmatmul.mubr.msk.f32.vlgmr.msra.gmra.mrb[6].mxu1 %vm645_vm2, %v1379_v63 }
 0x466   : > { %3110 = vmatpush3.xpose.msk.msra.mxu1 %vm645_vm2, %v1531_v0  ;;  %3111 = vmatprep.mubr.msk.f32.mxu1 %vm3492_vm1, %v3493_v27 }
 0x467   : > { %3114 = vmatprep.subr.mxu1 %v3493_v27 }
 0x469   : > { %3112 = vmatmul.mubr.msk.f32.vlgmr.msra.gmra.mrb[8].mxu1 %vm645_vm2, %v1526_v54  ;;  %v2864_v54 = vld [vmem:[%s4120_s4 + $0x78] sm:$0xff] }
 0x46a   : > { %3115 = vmatpush3.msra.mxu1 %v1620_v2  ;;  %3116 = vmatprep.mubr.msk.f32.mxu1 %vm3492_vm1, %v3493_v27  ;;  %v3297_v55 = vpack.c.bf16 %v2864_v54, %v2863_v53  ;;  %v2610_v53 = vld [vmem:[%s4129_s13 + $0x38] sm:$0xff] }
 0x46b   : > { %3124 = vmatprep.subr.mxu1 %v3493_v27 }
 0x538   : > { %v1450_v3 = vpop.f32.mrb[6].mxu1 }
 0x539   : > { %v3097_v4 = vpop.f32.mrb[7].mxu1 }
 0x53c   : > { %v1604_v5 = vpop.f32.mrb[8].mxu1 }
 0x53d   : > { %v3113_v6 = vpop.f32.mrb[9].mxu1  ;;  %v1608_v7 = vsel %vm645_vm2, %v1604_v5, -inf }
 0x53e   : > { %1609 = vmax.xlane.f32.xlu0 %v1608_v7 }
 0x5cb   : > { %v1610_v8 = vpop.xlane.xlu0 %1609 }
 0x5cc   : > { %v1611_v9 = vsub.f32 %v1604_v5, %v1610_v8 }
 0x5ce   : > { %v1612_v11 = vmul.f32 1.442695, %v1611_v9  ;;  %v2869_v9 = vld [vmem:[%s4123_s7 + $0x18] sm:$0xff] }
 0x5d0   : > { %3395 = vpow2.f32 %v1612_v11 }
 0x5da   : > { %v3396_v12 = vpop.eup %3395 }
 0x5db   : > { %v1614_v13 = vsel %vm645_vm2, %v3396_v12, 0.0 }
 0x5dc   : > { %1615 = vadd.xlane.f32.xlu1 %v1614_v13 }
 0x669   : > { %v1616_v15 = vpop.xlane.xlu1 %1615 }
 0x66a   : > { %3397 = vrcp.f32 %v1616_v15 }
 0x674   : > { %v3398_v16 = vpop.eup %3397 }
 0x675   : > { %v1618_v17 = vmul.f32 %v3398_v16, %v3396_v12 }
 0x677   : > { %3117 = vmatmul.mubr.msk.f32.vlgmr.msra.gmra.mrb[10].mxu1 %vm645_vm2, %v1618_v17 }
 0x678   : > { %3125 = vmatpush3.msra.mxu1 %v1454_v18  ;;  %3126 = vmatprep.mubr.msk.f32.mxu1 %vm3492_vm1, %v3493_v27 }
 0x679   : > { %3140 = vmatprep.subr.mxu1 %v3493_v27 }
 0x67b   : > { %3127 = vmatmul.mubr.msk.f32.vlgmr.msra.gmra.mrb[12].mxu1 %vm645_vm2, %v1450_v3 }
 0x67c   : > { %3142 = vmatprep.mubr.msk.f32.mxu1 %vm3492_vm1, %v3493_v27 }
 0x67f   : > { %3141 = vmatpush3.xpose.msk.msra.mxu1 %vm645_vm2, %v1918_v20  ;;  %v2871_v20 = vld [vmem:[%s4124_s8] ss:$0 sm:$0xff] }
 0x680   : > { %3145 = vmatprep.subr.mxu1 %v3493_v27 }
 0x74a   : > { %v1690_v26 = vpop.f32.mrb[10].mxu1 }
 0x74b   : > { %v3118_v28 = vpop.f32.mrb[11].mxu1  ;;  %3122 = vmatmul.mubr.msk.f32.vlgmr.msra.gmra.mrb[16].mxu0 %vm645_vm2, %v1690_v26 }
 0x74c   : > { %3289 = vmatpush3.bf16.msra.mxu0 %v3288_v10  ;;  %3137 = vmatprep.mubr.msk.f32.mxu0 %vm3492_vm1, %v3493_v27 }
 0x74d   : > { %3290 = vmatprep.subr.bf16.mxu0 %v3491_v19 }
 0x74e   : > { %v1838_v30 = vpop.f32.mrb[12].mxu1 }
 0x74f   : > { %v3128_v31 = vpop.f32.mrb[13].mxu1 }
 0x750   : > { %3292 = vmatpush3.bf16.msra.mxu0 %v3291_v29  ;;  %v2510_v29 = vld [vmem:[%s4127_s11] sm:$0xff]  ;;  %v2512_v31 = vld [vmem:[%s4127_s11 + $0x10] sm:$0xff] }
 0x751   : > { %3150 = vmatprep.subr.mxu0 %v3493_v27 }
 0x753   : > { %3138 = vmatmul.mubr.msk.f32.vlgmr.msra.gmra.mrb[18].mxu0 %vm539_vm0, %v3830_v23 }
 0x754   : > { %3152 = vmatprep.mubr.msk.f32.mxu0 %vm3492_vm1, %v3493_v27  ;;  %3151 = vmatpush3.msra.mxu0 %v2859_v46  ;;  %v2605_v46 = vld [vmem:[%s4129_s13 + $0x10] sm:$0xff] }
 0x755   : > { %3166 = vmatprep.subr.mxu0 %v3493_v27 }
 0x81e   : > { %v1765_v32 = vpop.f32.mrb[16].mxu0 }
 0x81f   : > { %v1839_v33 = vadd.f32 %v1838_v30, %v1765_v32  ;;  %v3123_v34 = vpop.f32.mrb[17].mxu0  ;;  %v2513_v32 = vld [vmem:[%s4127_s11 + $0x18] sm:$0xff] }
 0x820   : > { %v2603_v34 = vld [vmem:[%s4129_s13] sm:$0xff] }
 0x826   : > { %v1913_v35 = vpop.f32.mrb[18].mxu0 }
 0x827   : > { %v3139_v36 = vpop.f32.mrb[19].mxu0  ;;  %3143 = vmatmul.mubr.msk.f32.vlgmr.msra.gmra.mrb[14].mxu1 %vm645_vm2, %v1913_v35  ;;  %v2604_v35 = vld [vmem:[%s4129_s13 + $0x8] sm:$0xff] }
 0x828   : > { %3146 = vmatpush3.msra.mxu1 %v2007_v37  ;;  %3147 = vmatprep.mubr.msk.f32.mxu1 %vm3492_vm1, %v3493_v27  ;;  %v3306_v36 = vpack.c.bf16 %v2604_v35, %v2603_v34 }
 0x829   : > { %3293 = vmatprep.subr.bf16.mxu1 %v3491_v19 }
 0x8fa   : > { %v1991_v38 = vpop.f32.mrb[14].mxu1 }
 0x8fb   : > { %v3144_v39 = vpop.f32.mrb[15].mxu1  ;;  %v1995_v40 = vsel %vm645_vm2, %v1991_v38, -inf }
 0x8fc   : > { %1996 = vmax.xlane.f32.xlu0 %v1995_v40 }
 0x989   : > { %v1997_v41 = vpop.xlane.xlu0 %1996 }
 0x98a   : > { %v1998_v42 = vsub.f32 %v1991_v38, %v1997_v41  ;;  %v2872_v41 = vld [vmem:[%s4125_s9] ss:$0 sm:$0xff] }
 0x98c   : > { %v1999_v43 = vmul.f32 1.442695, %v1998_v42 }
 0x98e   : > { %3399 = vpow2.f32 %v1999_v43  ;;  %v2873_v43 = vld [vmem:[%s4126_s10] ss:$0 sm:$0xff] }
 0x998   : > { %v3400_v44 = vpop.eup %3399 }
 0x999   : > { %v2001_v45 = vsel %vm645_vm2, %v3400_v44, 0.0 }
 0x99a   : > { %2002 = vadd.xlane.f32.xlu1 %v2001_v45 }
 0xa27   : > { %v2003_v47 = vpop.xlane.xlu1 %2002 }
 0xa28   : > { %3401 = vrcp.f32 %v2003_v47  ;;  %v2606_v47 = vld [vmem:[%s4129_s13 + $0x18] sm:$0xff] }
 0xa29   : > { %v3309_v48 = vpack.c.bf16 %v2606_v47, %v2605_v46 }
 0xa32   : > { %v3402_v50 = vpop.eup %3401 }
 0xa33   : > { %v2005_v52 = vmul.f32 %v3402_v50, %v3400_v44  ;;  %v2608_v50 = vld [vmem:[%s4129_s13 + $0x28] sm:$0xff] }
 0xa35   : > { %3148 = vmatmul.mubr.msk.f32.vlgmr.msra.gmra.mrb[16].mxu1 %vm645_vm2, %v2005_v52  ;;  %v2609_v52 = vld [vmem:[%s4129_s13 + $0x30] sm:$0xff] }
 0xa36   : > { %3295 = vmatpush3.bf16.msra.mxu1 %v3294_v51  ;;  %3163 = vmatprep.mubr.msk.f32.mxu1 %vm3492_vm1, %v3493_v27  ;;  %v3312_v51 = vpack.c.bf16 %v2608_v50, %v2607_v49  ;;  %v3315_v54 = vpack.c.bf16 %v2610_v53, %v2609_v52 }
 0xa37   : > { %3296 = vmatprep.subr.bf16.mxu1 %v3491_v19 }
 0xa3a   : > { %3298 = vmatpush3.bf16.msra.mxu1 %v3297_v55  ;;  %v2611_v55 = vld [vmem:[%s4129_s13 + $0x40] sm:$0xff] }
 0xa3b   : > { %3176 = vmatprep.subr.mxu1 %v3493_v27 }
 0xa3d   : > { %3164 = vmatmul.mubr.msk.f32.vlgmr.msra.gmra.mrb[18].mxu1 %vm539_vm0, %v3830_v23  ;;  %v2322_v23 = vld [vmem:[#allocation3 + $0x18] sm:$0xff] }
 0xa3e   : > { %3178 = vmatprep.mubr.msk.f32.mxu1 %vm3492_vm1, %v3493_v27  ;;  %3177 = vmatpush3.msra.mxu1 %v2869_v9 }
 0xa3f   : > { %3305 = vmatprep.subr.bf16.mxu1 %v3491_v19 }
 0xb08   : > { %v2077_v56 = vpop.f32.mrb[16].mxu1 }
 0xb09   : > { %v3149_v57 = vpop.f32.mrb[17].mxu1  ;;  %3153 = vmatmul.mubr.msk.f32.vlgmr.msra.gmra.mrb[20].mxu0 %vm645_vm2, %v2077_v56  ;;  %v2612_v56 = vld [vmem:[%s4129_s13 + $0x48] sm:$0xff] }
 0xb0a   : > { %3167 = vmatpush3.xpose.msk.msra.mxu0 %vm645_vm2, %v2233_v58  ;;  %3168 = vmatprep.mubr.msk.f32.mxu0 %vm3492_vm1, %v3493_v27  ;;  %v3318_v57 = vpack.c.bf16 %v2612_v56, %v2611_v55  ;;  %v2613_v58 = vld [vmem:[%s4129_s13 + $0x50] sm:$0xff] }
 0xb0b   : > { %3171 = vmatprep.subr.mxu0 %v3493_v27 }
 0xb10   : > { %v2228_v59 = vpop.f32.mrb[18].mxu1 }
 0xb11   : > { %v3165_v60 = vpop.f32.mrb[19].mxu1  ;;  %3169 = vmatmul.mubr.msk.f32.vlgmr.msra.gmra.mrb[22].mxu0 %vm645_vm2, %v2228_v59  ;;  %v2614_v59 = vld [vmem:[%s4129_s13 + $0x58] sm:$0xff] }
 0xb12   : > { %3172 = vmatpush3.msra.mxu0 %v2322_v23  ;;  %3173 = vmatprep.mubr.msk.f32.mxu0 %vm3492_vm1, %v3493_v27  ;;  %v3321_v60 = vpack.c.bf16 %v2614_v59, %v2613_v58  ;;  %v2615_v23 = vld [vmem:[%s4129_s13 + $0x60] sm:$0xff] }
 0xb13   : > { %3299 = vmatprep.subr.bf16.mxu0 %v3491_v19 }
 0xbdc   : > { %v2152_v61 = vpop.f32.mrb[20].mxu0 }
 0xbdd   : > { %v2156_v62 = vadd.f32 %v2152_v61, %v1839_v33  ;;  %v3154_v63 = vpop.f32.mrb[21].mxu0  ;;  %v3303_v33 = vpack.c.bf16 %v2513_v32, %v2512_v31  ;;  %v2616_v61 = vld [vmem:[%s4129_s13 + $0x68] sm:$0xff] }
 0xbde   : > { %v2617_v63 = vld [vmem:[%s4129_s13 + $0x70] sm:$0xff] }
 0xbe4   : > { %v2306_v0 = vpop.f32.mrb[22].mxu0 }
 0xbe5   : > { %v3170_v2 = vpop.f32.mrb[23].mxu0  ;;  %v2310_v3 = vsel %vm645_vm2, %v2306_v0, -inf }
 0xbe6   : > { %2311 = vmax.xlane.f32.xlu0 %v2310_v3  ;;  %v2874_v3 = vld [vmem:[%s4128_s12] ss:$0 sm:$0xff] }
 0xc73   : > { %v2312_v4 = vpop.xlane.xlu0 %2311 }
 0xc74   : > { %v2313_v5 = vsub.f32 %v2306_v0, %v2312_v4  ;;  %v2618_v0 = vld [vmem:[%s4129_s13 + $0x78] sm:$0xff] }
 0xc75   : > { %v3327_v2 = vpack.c.bf16 %v2618_v0, %v2617_v63 }
 0xc76   : > { %v2314_v6 = vmul.f32 1.442695, %v2313_v5 }
 0xc78   : > { %3403 = vpow2.f32 %v2314_v6 }
 0xc82   : > { %v3404_v7 = vpop.eup %3403 }
 0xc83   : > { %v2316_v8 = vsel %vm645_vm2, %v3404_v7, 0.0 }
 0xc84   : > { %2317 = vadd.xlane.f32.xlu1 %v2316_v8 }
 0xd11   : > { %v2318_v11 = vpop.xlane.xlu1 %2317 }
 0xd12   : > { %3405 = vrcp.f32 %v2318_v11 }
 0xd1c   : > { %v3406_v12 = vpop.eup %3405 }
 0xd1d   : > { %v2320_v13 = vmul.f32 %v3406_v12, %v3404_v7 }
 0xd1f   : > { %3174 = vmatmul.mubr.msk.f32.vlgmr.msra.gmra.mrb[24].mxu0 %vm645_vm2, %v2320_v13 }
 0xd20   : > { %3189 = vmatprep.mubr.msk.f32.mxu0 %vm3492_vm1, %v3493_v27 }
 0xdf2   : > { %v2392_v14 = vpop.f32.mrb[24].mxu0 }
 0xdf3   : > { %v3175_v15 = vpop.f32.mrb[25].mxu0  ;;  %3179 = vmatmul.mubr.msk.f32.vlgmr.msra.gmra.mrb[20].mxu1 %vm645_vm2, %v2392_v14 }
 0xdf4   : > { %3224 = vmatprep.mubr.msk.f32.mxu1 %vm3492_vm1, %v3493_v27  ;;  %3307 = vmatpush3.bf16.msra.mxu1 %v3306_v36 }
 0xdf5   : > { %3308 = vmatprep.subr.bf16.mxu1 %v3491_v19 }
 0xdf8   : > { %3310 = vmatpush3.bf16.msra.mxu1 %v3309_v48 }
 0xdf9   : > { %3311 = vmatprep.subr.bf16.mxu1 %v3491_v19 }
 0xdfc   : > { %3313 = vmatpush3.bf16.msra.mxu1 %v3312_v51 }
 0xdfd   : > { %3314 = vmatprep.subr.bf16.mxu1 %v3491_v19 }
 0xe00   : > { %3316 = vmatpush3.bf16.msra.mxu1 %v3315_v54 }
 0xe01   : > { %3317 = vmatprep.subr.bf16.mxu1 %v3491_v19 }
 0xe04   : > { %3319 = vmatpush3.bf16.msra.mxu1 %v3318_v57 }
 0xe05   : > { %3320 = vmatprep.subr.bf16.mxu1 %v3491_v19 }
 0xe08   : > { %3322 = vmatpush3.bf16.msra.mxu1 %v3321_v60 }
 0xe09   : > { %3323 = vmatprep.subr.bf16.mxu1 %v3491_v19 }
 0xec6   : > { %v2467_v16 = vpop.f32.mrb[20].mxu1 }
 0xec7   : > { %v2471_v17 = vadd.f32 %v2467_v16, %v2156_v62  ;;  %v3180_v18 = vpop.f32.mrb[21].mxu1  ;;  %v3324_v62 = vpack.c.bf16 %v2616_v61, %v2615_v23  ;;  %v2876_v16 = vld [vmem:[%s4130_s14] ss:$0 sm:$0xff] }
 0xec9   : > { %v2472_v21 = vadd.f32 %v2471_v17, %v3638_v1  ;;  %v2511_v1 = vld [vmem:[%s4127_s11 + $0x8] sm:$0xff]  ;;  %3325 = vmatpush3.bf16.msra.mxu1 %v3324_v62 }
 0xeca   : > { %v3300_v30 = vpack.c.bf16 %v2511_v1, %v2510_v29  ;;  %3326 = vmatprep.subr.bf16.mxu1 %v3491_v19 }
 0xecb   : > { %v3975_v22 = vadd.f32 %v2871_v20, %v2472_v21 }
 0xecc   : > { %3301 = vmatpush3.bf16.msra.mxu0 %v3300_v30 }
 0xecd   : > { %v2483_v10 = vsel %vm539_vm0, %v3975_v22, 0.0  ;;  %3302 = vmatprep.subr.bf16.mxu0 %v3491_v19  ;;  %3328 = vmatpush3.bf16.msra.mxu1 %v3327_v2 }
 0xece   : > { %2484 = vadd.xlane.f32.xlu0 %v2483_v10 }
 0xed0   : > { %3304 = vmatpush3.bf16.msra.mxu0 %v3303_v33 }
 0xf5b   : > { %v2485_v24 = vpop.xlane.xlu0 %2484 }
 0xf5c   : > { %v2486_v25 = vmul.f32 0.03125, %v2485_v24 }
 0xf5e   : > { %v2487_v26 = vsub.f32 %v3975_v22, %v2486_v25 }
 0xf60   : > { %v2488_v27 = vmul.f32 %v2487_v26, %v2487_v26 }
 0xf62   : > { %v2489_v28 = vsel %vm539_vm0, %v2488_v27, 0.0 }
 0xf63   : > { %2490 = vadd.xlane.f32.xlu1 %v2489_v28 }
 0xff0   : > { %v2491_v37 = vpop.xlane.xlu1 %2490 }
 0xff1   : > { %v2492_v38 = vmul.f32 0.03125, %v2491_v37 }
 0xff3   : > { %v2493_v39 = vadd.f32 1e-05, %v2492_v38 }
 0xff5   : > { %3407 = vrsqrt.f32 %v2493_v39 }
 0xfff   : > { %v3408_v40 = vpop.eup %3407 }
0x1000   : > { %v2495_v42 = vmul.f32 %v3408_v40, %v2487_v26 }
0x1002   : > { %v2502_v44 = vmul.f32 %v2872_v41, %v2495_v42 }
0x1004   : > { %v2509_v45 = vadd.f32 %v2873_v43, %v2502_v44 }
0x1006   : > { %3190 = vmatmul.mubr.msk.f32.vlgmr.msra.gmra.mrb[26].mxu0 %vm539_vm0, %v2509_v45 }
0x10d9   : > { %v2590_v4 = vpop.f32.mrb[26].mxu0 }
0x10da   : > { %v2591_v5 = vadd.f32 %v2874_v3, %v2590_v4  ;;  %v3191_v6 = vpop.f32.mrb[27].mxu0 }
0x10dc   : > { %v2595_v7 = vmul.f32 0.044715, %v2591_v5  ;;  %v2594_v14 = vmul.f32 0.5, %v2591_v5 }
0x10de   : > { %v2596_v8 = vmul.f32 %v2595_v7, %v2591_v5 }
0x10e0   : > { %v2597_v9 = vmul.f32 %v2596_v8, %v2591_v5 }
0x10e2   : > { %v2598_v11 = vadd.f32 %v2597_v9, %v2591_v5 }
0x10e4   : > { %v2599_v12 = vmul.f32 0.7978846, %v2598_v11 }
0x10e6   : > { %3409 = vtanh.f32 %v2599_v12 }
0x10f0   : > { %v3410_v13 = vpop.eup %3409 }
0x10f1   : > { %v2601_v15 = vadd.f32 1.0, %v3410_v13 }
0x10f3   : > { %v2602_v19 = vmul.f32 %v2601_v15, %v2594_v14 }
0x10f5   : > { %3225 = vmatmul.mubr.f32.vlgmr.msra.gmra.mrb[22].mxu1 %v2602_v19 }
0x11c8   : > { %v2692_v17 = vpop.f32.mrb[22].mxu1 }
0x11c9   : > { %v2693_v18 = vadd.f32 %v2876_v16, %v2692_v17  ;;  %v3226_v20 = vpop.f32.mrb[23].mxu1 }
0x11cb   : > { %v2696_v21 = vadd.f32 %v2693_v18, %v3975_v22 }
0x11cd   : > { %2697 = vst.msk [vmem:[%s520_s26] sm:$0xff] %vm539_vm0, %v2696_v21 }
0x11ce   : > { %3424 = shalt.err (!%p3421_p5)
}
0x11cf   : > { %s3425_s25 = scalar_lea.hbm %s4068_s1, 128  ;;  %s3429_s27 = scalar_lea.hbm %s4148_s24, 256 }
0x11d0   : > { %p3426_p6 = scmp.ne.s32.totalorder %s4068_s1, %s3425_s25  ;;  %p3430_p10 = scmp.lt.u32.totalorder %s4068_s1, %s4148_s24 }
0x11d1   : > { %p3431_p11 = scmp.lt.u32.totalorder %s3429_s27, %s3425_s25  ;;  %p3433_p13 = scmp.lt.u32.totalorder %s3425_s25, %s4068_s1 }
0x11d2   : > { %p3427_p7 = pnand %p3426_p6, %p3615_p4 }
0x11d3   : > { %p3432_p12 = por %p3431_p11, %p3430_p10 }
0x11d4   : > { %p3428_p9 = pneg %p3427_p7 }
0x11d5   : > { %p3434_p0 = por %p3433_p13, %p3432_p12 }
0x11d7   : > { %p3435_p1 = pnand %p3434_p0, %p3428_p9 }
0x11d9   : > { %3438 = shalt.err (!%p3435_p1)
}
0x11da   : > { %3329 = dma.vmem_to_hbm [thread:$0]  (%p3615_p4), %s4070_s0, 128, %s4068_s1, %s2699_s15  }
0x11db PF: > { %s4149_s2 = sld [smem:[#allocation7_spill]]  ;;  %p3335_p2 = scmp.ge.s32.totalorder %s3489_s23, 2 }
0x11dd   : > { %p3332_p3 = pnand %p3335_p2, %p3622_p8 }
0x11e1   : > { %s2725_s21 = sand.u32 1, %s4149_s2  }
0x11e2   : > { %s2726_s18 = scalar_lea.sflag [#allocation5], %s2725_s21 }
0x11e3   : > { %3464 = dma.done.wait (!%p3332_p3), %s2726_s18, 128  }
0x11e4   : > { %3466 = vsyncadd (!%p3332_p3), %s2726_s18, 4294967168  ;;  %s28_s23 = sadd.s32 1, %s3489_s23   ;;  %s4150_s21 = sld [smem:[#allocation8_spill]] }
0x11e5   : > { %p25_p5 = scmp.ge.s32.totalorder %s28_s23, 4   ;;  %s4151_s22 = sld [smem:[#allocation9_spill]] }
0x11e6   : > { %s4152_s18 = smov %s3473_s19  ;;  %s4153_s19 = smov %s3477_s20 }
0x11e7   : > { %s4154_s20 = smov %s3628_s16  ;;  %27 = sbr.rel (!%p25_p5) target bundleno = 9 (0x9), region = 146 }
0x11ee   :  { %2731 = vsyncpa [#allocation5], 1 }
0x11ef   :  { %2733 = vsyncpa [#allocation5 + $0x1], 1 }

</bundles_post_ra>
